<compile_context>
chip_gen: v7x
topology: tpu7x:2x2x1
jax: 0.10.0
libtpu: 0.0.40
codegen_flags: <defaults>
</compile_context>

<pallas_src>
import functools

import numpy as np
import jax
import jax.numpy as jnp
from jax import lax
from jax.experimental import pallas as pl
from jax.experimental.pallas import tpu as pltpu

POOL_T, POOL_H, POOL_W = 2, 7, 7          # AvgPool3d kernel, stride 1
LOGITS_IN = 384 + 384 + 128 + 128         # 1024 (hard-coded in the module)
NUM_CLASSES = 400                         # module default


def _i3d_logits_kernel(x_ref, p_ref, w_ref, b_ref, o_ref, *, kb_block):
    """Fused AvgPool3d(2,7,7, stride 1) + 1x1x1 Conv3d + bias.

    x_ref : (KB, C, L)   bf16, channels-first block, L = T*H*W flattened spatial
    p_ref : (L, M)       bf16, constant 0/1 pooling matrix, M = Tp*Hp*Wp
    w_ref : (C, Npad)    bf16, conv weight pre-scaled by 1/(2*7*7), N padded to mult of 128
    b_ref : (1, Npad)    f32, conv bias (zero-padded)
    o_ref : (KB, M, Npad) f32
    """
    p = p_ref[...]
    w = w_ref[...]
    bias = b_ref[...]
    for kb in range(kb_block):
        xk = x_ref[kb]                                            # (C, L) bf16
        # Pool-window sums on the MXU: (C, L) @ (L, M) -> (C, M), f32 accumulate.
        s = jnp.dot(xk, p, preferred_element_type=jnp.float32)
        # 1x1x1 conv == contract C: (C, M)^T @ (C, Npad) -> (M, Npad) on the MXU.
        y = lax.dot_general(
            s.astype(jnp.bfloat16), w,
            dimension_numbers=(((0,), (0,)), ((), ())),
            preferred_element_type=jnp.float32)
        o_ref[kb] = (y + bias).astype(o_ref.dtype)


def _choose_batch_block(B, C, L):
    """Batch elements per grid step: amortize per-step overhead, cap VMEM, keep >=2 steps."""
    l_pad = ((L + 127) // 128) * 128
    per_elem = 2 * C * l_pad * 2          # double-buffered bf16 bytes per batch element
    cap = max(1, (6 * 1024 * 1024) // per_elem)
    kb = 1
    for cand in (8, 4, 2, 1):
        if cand <= cap and B % cand == 0:
            kb = cand
            break
    # Prefer at least 2 grid steps so the second TensorCore (v7x) gets work.
    while kb > 1 and B // kb < 2:
        kb //= 2
    return kb


def i3d_logits_forward(x_ncdhw, w_cn, bias_n, *, spatial_squeeze=True):
    """Forward of MemoryEfficientI3D(final_endpoint='Logits') in eval mode.

    x_ncdhw : (B, C=1024, T, H, W) float32   (PyTorch NCDHW layout)
    w_cn    : (C, num_classes)               (Conv3d weight (O,I,1,1,1) transposed)
    bias_n  : (num_classes,)
    """
    B, C, T, H, W = x_ncdhw.shape
    assert C == LOGITS_IN, "logits layer expects 1024 input channels"
    Tp, Hp, Wp = T - POOL_T + 1, H - POOL_H + 1, W - POOL_W + 1
    assert Tp >= 1 and Hp >= 1 and Wp >= 1
    N = w_cn.shape[1]
    L = T * H * W
    M = Tp * Hp * Wp
    Npad = ((N + 127) // 128) * 128

    # TODO(synk): nn.Dropout(p=0.5) is stochastic in training mode; implemented as
    # eval-mode identity here.

    # Channels-first kept; only the spatial axes are flattened (free reshape, no transpose).
    # bf16 stream halves the dominant HBM DMA (upstream activations would already be bf16).
    x_flat = x_ncdhw.reshape(B, C, L).astype(jnp.bfloat16)

    # Constant 0/1 pooling matrix (L, M); 1/(2*7*7) is folded into the conv weight.
    P = np.zeros((L, M), np.float32)
    for tp in range(Tp):
        for hp in range(Hp):
            for wp in range(Wp):
                m = (tp * Hp + hp) * Wp + wp
                for dt in range(POOL_T):
                    for dh in range(POOL_H):
                        for dw in range(POOL_W):
                            l = ((tp + dt) * H + (hp + dh)) * W + (wp + dw)
                            P[l, m] = 1.0
    p_lm = jnp.asarray(P, jnp.bfloat16)

    inv_pool = 1.0 / float(POOL_T * POOL_H * POOL_W)
    w_pad = jnp.pad(w_cn * inv_pool, ((0, 0), (0, Npad - N))).astype(jnp.bfloat16)
    b_pad = jnp.pad(bias_n, (0, Npad - N)).astype(jnp.float32).reshape(1, Npad)

    KB = _choose_batch_block(B, C, L)
    kernel = functools.partial(_i3d_logits_kernel, kb_block=KB)

    out = pl.pallas_call(
        kernel,
        out_shape=jax.ShapeDtypeStruct((B, M, Npad), jnp.float32),
        grid_spec=pltpu.PrefetchScalarGridSpec(
            num_scalar_prefetch=0,
            grid=(B // KB,),
            in_specs=[
                pl.BlockSpec((KB, C, L), lambda i: (i, 0, 0)),
                pl.BlockSpec((L, M), lambda i: (0, 0)),
                pl.BlockSpec((C, Npad), lambda i: (0, 0)),
                pl.BlockSpec((1, Npad), lambda i: (0, 0)),
            ],
            out_specs=pl.BlockSpec((KB, M, Npad), lambda i: (i, 0, 0)),
        ),
        compiler_params=pltpu.CompilerParams(dimension_semantics=("parallel",)),
    )(x_flat, p_lm, w_pad, b_pad)

    # Tiny post-processing (B*M*N values): un-pad N, restore NCDHW, replicate squeeze.
    y = out[:, :, :N].reshape(B, Tp, Hp, Wp, N)
    y = jnp.transpose(y, (0, 4, 1, 2, 3))  # (B, N, Tp, Hp, Wp)

    if spatial_squeeze:
        # Replicate torch's x.squeeze(3).squeeze(3): only drops size-1 dims.
        if y.shape[3] == 1:
            y = jnp.squeeze(y, axis=3)      # drop H' dim
            if y.shape[3] == 1:
                y = jnp.squeeze(y, axis=3)  # drop W' dim (now at axis 3)
    return y


def _reference_forward(x_ncdhw, w_cn, bias_n, *, spatial_squeeze=True):
    """Pure-JAX f32 reference of the same forward pass."""
    B, C, T, H, W = x_ncdhw.shape
    Tp, Hp, Wp = T - POOL_T + 1, H - POOL_H + 1, W - POOL_W + 1
    acc = jnp.zeros((B, C, Tp, Hp, Wp), jnp.float32)
    for dt in range(POOL_T):
        for dh in range(POOL_H):
            for dw in range(POOL_W):
                acc = acc + x_ncdhw[:, :, dt:dt + Tp, dh:dh + Hp, dw:dw + Wp]
    pooled = acc / float(POOL_T * POOL_H * POOL_W)
    y = jnp.einsum("bctij,cn->bntij", pooled, w_cn) + bias_n[None, :, None, None, None]
    if spatial_squeeze:
        if y.shape[3] == 1:
            y = jnp.squeeze(y, axis=3)
            if y.shape[3] == 1:
                y = jnp.squeeze(y, axis=3)
    return y


if __name__ == "__main__":
    key = jax.random.PRNGKey(0)
    k_x, k_w = jax.random.split(key)

    # Deterministic "kaiming_normal_(mode='fan_out', nonlinearity='relu')" for the
    # 1x1x1 conv: fan_out = num_classes * 1 * 1 * 1, std = sqrt(2 / fan_out).
    std = (2.0 / float(NUM_CLASSES)) ** 0.5
    w_oc_ic = std * jax.random.normal(k_w, (NUM_CLASSES, LOGITS_IN), jnp.float32)
    w_cn = w_oc_ic.T                                   # (C_in, num_classes)
    bias_n = jnp.zeros((NUM_CLASSES,), jnp.float32)    # nn.init.constant_(bias, 0)

    # Small input consistent with the forward: channels must be 1024 for the logits conv;
    # T >= 2 and H, W >= 7 for the (2,7,7) average pool.
    B, T, H, W = 2, 3, 7, 7
    x = jax.random.normal(k_x, (B, LOGITS_IN, T, H, W), jnp.float32)

    out = i3d_logits_forward(x, w_cn, bias_n, spatial_squeeze=True)
    out = jax.block_until_ready(out)

    ref = jax.block_until_ready(_reference_forward(x, w_cn, bias_n, spatial_squeeze=True))
    assert out.shape == ref.shape == (B, NUM_CLASSES, T - 1), (out.shape, ref.shape)
    assert jnp.allclose(out, ref, atol=2e-2, rtol=2e-2), float(jnp.max(jnp.abs(out - ref)))

    print("KERNEL_OK")
</pallas_src>

<mosaic_0001>
module attributes {stable_mosaic.version = 11 : i64} {
  func.func @_i3d_logits_kernel(%arg0: i32, %arg1: memref<1x1024x147xbf16, #tpu.memory_space<vmem>>, %arg2: memref<147x2xbf16, #tpu.memory_space<vmem>>, %arg3: memref<1024x512xbf16, #tpu.memory_space<vmem>>, %arg4: memref<1x512xf32, #tpu.memory_space<vmem>>, %arg5: memref<1x2x512xf32, #tpu.memory_space<vmem>>) attributes {dimension_semantics = [#tpu.dimension_semantics<parallel>], iteration_bounds = array<i64: 2>, scalar_prefetch = 0 : i64, scratch_operands = 0 : i64, tpu.core_type = #tpu.core_type<tc>, window_params = [{transform_indices = @transform_0, window_bounds = array<i64: 1, 1024, 147>}, {pipeline_mode = #tpu.pipeline_mode<synchronous>, transform_indices = @transform_1, window_bounds = array<i64: 147, 2>}, {pipeline_mode = #tpu.pipeline_mode<synchronous>, transform_indices = @transform_2, window_bounds = array<i64: 1024, 512>}, {pipeline_mode = #tpu.pipeline_mode<synchronous>, transform_indices = @transform_3, window_bounds = array<i64: 1, 512>}, {transform_indices = @transform_4, window_bounds = array<i64: 1, 2, 512>}]} {
    %c0 = arith.constant 0 : index
    %c0_0 = arith.constant 0 : index
    %0 = vector.load %arg2[%c0, %c0_0] : memref<147x2xbf16, #tpu.memory_space<vmem>>, vector<147x2xbf16>
    %c0_1 = arith.constant 0 : index
    %c0_2 = arith.constant 0 : index
    %1 = vector.load %arg3[%c0_1, %c0_2] : memref<1024x512xbf16, #tpu.memory_space<vmem>>, vector<1024x512xbf16>
    %c0_3 = arith.constant 0 : index
    %c0_4 = arith.constant 0 : index
    %2 = vector.load %arg4[%c0_3, %c0_4] : memref<1x512xf32, #tpu.memory_space<vmem>>, vector<1x512xf32>
    %c0_5 = arith.constant 0 : index
    %c0_6 = arith.constant 0 : index
    %c0_7 = arith.constant 0 : index
    %3 = vector.load %arg1[%c0_5, %c0_6, %c0_7] : memref<1x1024x147xbf16, #tpu.memory_space<vmem>>, vector<1x1024x147xbf16>
    %4 = vector.shape_cast %3 : vector<1x1024x147xbf16> to vector<1024x147xbf16>
    %cst = arith.constant dense<0.000000e+00> : vector<1024x2xf32>
    %5 = tpu.matmul %4, %0, %cst {dimension_numbers = #tpu.dot_dimension_numbers<[1], [0], [0], [1], [0, 0, 1, 1], [], []>} : vector<1024x147xbf16>, vector<147x2xbf16>, vector<1024x2xf32> -> vector<1024x2xf32>
    %6 = arith.truncf %5 : vector<1024x2xf32> to vector<1024x2xbf16>
    %cst_8 = arith.constant dense<0.000000e+00> : vector<2x512xf32>
    %7 = tpu.matmul %6, %1, %cst_8 {dimension_numbers = #tpu.dot_dimension_numbers<[0], [0], [1], [1], [0, 1, 1, 1], [], []>} : vector<1024x2xbf16>, vector<1024x512xbf16>, vector<2x512xf32> -> vector<2x512xf32>
    %8 = vector.broadcast %2 : vector<1x512xf32> to vector<2x512xf32>
    %9 = arith.addf %7, %8 : vector<2x512xf32>
    %c0_9 = arith.constant 0 : index
    %c0_10 = arith.constant 0 : index
    %c0_11 = arith.constant 0 : index
    %10 = vector.load %arg5[%c0_9, %c0_10, %c0_11] : memref<1x2x512xf32, #tpu.memory_space<vmem>>, vector<1x2x512xf32>
    %11 = vector.shape_cast %10 : vector<1x2x512xf32> to vector<2x512xf32>
    %12 = vector.shape_cast %9 : vector<2x512xf32> to vector<1x2x512xf32>
    tpu.vector_store %arg5[%c0_9, %c0_10, %c0_11], %12 {strides = array<i32>} : memref<1x2x512xf32, #tpu.memory_space<vmem>>, vector<1x2x512xf32>,
    return
  }
  func.func @transform_0(%arg0: i32) -> (i32, i32, i32) {
    %c0_i32 = arith.constant 0 : i32
    %c0_i32_0 = arith.constant 0 : i32
    %c0_i32_1 = arith.constant 0 : i32
    return %arg0, %c0_i32, %c0_i32_0 : i32, i32, i32
  }
  func.func @transform_1(%arg0: i32) -> (i32, i32) {
    %c0_i32 = arith.constant 0 : i32
    %c0_i32_0 = arith.constant 0 : i32
    %c0_i32_1 = arith.constant 0 : i32
    return %c0_i32, %c0_i32_0 : i32, i32
  }
  func.func @transform_2(%arg0: i32) -> (i32, i32) {
    %c0_i32 = arith.constant 0 : i32
    %c0_i32_0 = arith.constant 0 : i32
    %c0_i32_1 = arith.constant 0 : i32
    return %c0_i32, %c0_i32_0 : i32, i32
  }
  func.func @transform_3(%arg0: i32) -> (i32, i32) {
    %c0_i32 = arith.constant 0 : i32
    %c0_i32_0 = arith.constant 0 : i32
    %c0_i32_1 = arith.constant 0 : i32
    return %c0_i32, %c0_i32_0 : i32, i32
  }
  func.func @transform_4(%arg0: i32) -> (i32, i32, i32) {
    %c0_i32 = arith.constant 0 : i32
    %c0_i32_0 = arith.constant 0 : i32
    %c0_i32_1 = arith.constant 0 : i32
    return %arg0, %c0_i32, %c0_i32_0 : i32, i32, i32
  }
}

</mosaic_0001>

<bundles_post_ra>
// kernel: tpu_custom_call.1
= control target key start
LH: loop header
LB: loop body
LE: loop exit
PB: predicated region body
PF: predicated region fallthrough
CT: control target
= control target key end

     0   :  { %9 = vsyncpa [#allocation3], 0  ;;  %s6264_s0 = inlined_call_operand.vmem [shape: bf16[2,1024,147], index: 0, kind: input, shape index: {}]   ;;  %s6265_s1 = inlined_call_operand.vmem [shape: bf16[147,2], index: 1, kind: input, shape index: {}]   ;;  %s6266_s2 = inlined_call_operand.vmem [shape: bf16[1024,512], index: 2, kind: input, shape index: {}]   ;;  %s6267_s3 = inlined_call_operand.vmem [shape: f32[1,512], index: 3, kind: input, shape index: {}]   ;;  %s6268_s4 = inlined_call_operand.hbm [shape: f32[2,2,512], index: 4, kind: output, shape index: {}]  }
   0x1   :  { %11 = vsyncpa [#allocation3 + $0x1], 0  ;;  %s5118_s15 = smov 0   ;;  %s5120_s16 = smov 0  }
   0x2   :  { %s5122_s17 = smov 0   ;;  %s5124_s18 = smov 0  }
   0x3 LB: > { %s5139_s19 = sadd.s32 4294967295, %s5087_s18   ;;  %s3897_s20 = sadd.s32 4294967294, %s5087_s18   ;;  %s5087_s18 = sphi %s5124_s18, %s6274_s18   ;;  %s5083_s17 = sphi %s5122_s17, %s6273_s17   ;;  %s5079_s16 = sphi %s5120_s16, %s6272_s16   ;;  %s5075_s15 = sphi %s5118_s15, %s6271_s15  }
   0x4   : > { %s5143_s21 = sadd.s32 1, %s5087_s18   ;;  %s113_s22 = sadd.s32 1, %s5083_s17 }
   0x5   : > { %s110_s23 = ssub.s32 %s5087_s18, %s5143_s21  ;;  %p123_p0 = scmp.ne.s32.totalorder %s5083_s17, %s5079_s16 }
   0x6   : > { %p111_p1 = scmp.eq.s32.totalorder %s110_s23, 0  ;;  %p124_p2 = scmp.eq.s32.totalorder %s5139_s19, 1 }
   0x7   : > { %p129_p3 = scmp.ne.s32.totalorder %s5079_s16, %s5075_s15  ;;  %p130_p4 = scmp.eq.s32.totalorder %s3897_s20, 1 }
   0x8   : > { %s5154_s24 = scalar_select %p111_p1, %s5083_s17, %s113_s22  }
   0x9   : > { %p5156_p5 = por %p124_p2, %p123_p0  ;;  %p5160_p6 = por %p130_p4, %p129_p3 }
   0xa   : > { %p3900_p7 = scmp.ge.s32.totalorder %s5087_s18, 1  ;;  %p165_p8 = scmp.lt.s32.totalorder %s5087_s18, 3 }
   0xc   : > { %p166_p9 = pnand %p3900_p7, %p165_p8 }
   0xd   : > { %v4439_v0 = vld [vmem:[%s6265_s1] sm:$0xff] (!%p166_p9)   ;;  %v5089_v1 = vmov (!%p166_p9), 0   ;;  %v4440_v2 = vld [vmem:[%s6265_s1 + $0x8] sm:$0xff] (!%p166_p9)   ;;  %v4441_v3 = vld [vmem:[%s6265_s1 + $0x10] sm:$0xff] (!%p166_p9)   ;;  %p191_p10 = scmp.lt.s32.totalorder (!%p166_p9), %s5139_s19, 1  ;;  %vm1234_vm0 = vcmask (!%p166_p9), 154624  }
   0xe   : > { %169 = sbr.rel (%p166_p9) target bundleno = 1341 (0x53d), region = 36  ;;  %1434 = vmatprep.subr.bf16.mxu0 (!%p166_p9), %v5089_v1  ;;  %v4442_v4 = vld [vmem:[%s6265_s1 + $0x18] sm:$0xff] (!%p166_p9)   ;;  %v4443_v6 = vld [vmem:[%s6265_s1 + $0x20] sm:$0xff] (!%p166_p9)   ;;  %v4444_v7 = vld [vmem:[%s6265_s1 + $0x28] sm:$0xff] (!%p166_p9)   ;;  %vm1427_vm1 = vcmask (!%p166_p9), 1040384   ;;  %vm1428_vm2 = vcmask (!%p166_p9), 1041408  }
   0xf   : > { %1435 = vmatpush1.bf16.msra.mxu0 (!%p166_p9), %v4439_v0  ;;  %v4445_v8 = vld [vmem:[%s6265_s1 + $0x30] sm:$0xff] (!%p166_p9)   ;;  %v4446_v9 = vld [vmem:[%s6265_s1 + $0x38] sm:$0xff] (!%p166_p9)   ;;  %v5090_v10 = vmov (!%p166_p9), 65535   ;;  %v4447_v12 = vld [vmem:[%s6265_s1 + $0x40] sm:$0xff] (!%p166_p9)   ;;  %s188_s28 = sand.u32 (!%p166_p9), 1, %s5079_s16   ;;  %s4368_s30 = sshll.u32 (!%p166_p9), %s5139_s19, 7 }
  0x10   : > { %1436 = vmatprep.subr.bf16.mxu0 (!%p166_p9), %v5089_v1  ;;  %v1429_v11 = vsel (!%p166_p9), %vm1427_vm1, 4294967295, %v5090_v10  ;;  %v4448_v13 = vld [vmem:[%s6265_s1 + $0x48] ss:$0 sps:$4 sm:$0x33] (!%p166_p9)   ;;  %s3901_s29 = sshll.u32 (!%p166_p9), %s188_s28, 3  ;;  %s6222_s9 = scalar_lea.hbm (!%p166_p9), %s6268_s4, %s4368_s30 }
  0x11   : > { %v1430_v14 = vsel (!%p166_p9), %vm1428_vm2, %v1429_v11, 0  ;;  %s190_s5 = scalar_lea.vmem (!%p166_p9), [#allocation2], %s3901_s29 }
  0x12   : > { %v1432_v15 = vand.u32 (!%p166_p9), %v4448_v13, %v1430_v14  ;;  %s3838_s6 = sshll.u32 (!%p166_p9), %s190_s5, 4  ;;  %s6224_s6 = int_to_ptr.vmem [resolvable:$true] %s3838_s6 }
  0x13   : > { %1437 = vmatpush1.bf16.msra.mxu0 (!%p166_p9), %v4440_v2 }
  0x14   : > { %1438 = vmatprep.subr.bf16.mxu0 (!%p166_p9), %v5089_v1 }
  0x15   : > { %s192_s7 = scalar_select %p191_p10, %s5139_s19, 1 }
  0x16   : > { %s5092_s19 = smov [#allocation2]  }
  0x17   : > { %1439 = vmatpush1.bf16.msra.mxu0 %v4441_v3  ;;  %s4367_s10 = sshll.u32 %s192_s7, 10  ;;  %s5029_s11 = sshll.u32 %s5092_s19, 4  ;;  %s5030_s11 = int_to_ptr.vmem [resolvable:$false] %s5029_s11 }
  0x18   : > { %1440 = vmatprep.subr.bf16.mxu0 %v5089_v1  ;;  %s5183_s13 = scalar_lea.vmem %s6264_s0, %s4367_s10  ;;  %s3824_s10 = scalar_lea.sflag [#allocation3], %s188_s28 }
  0x19   : > { %v4451_v5 = vld [vmem:[%s5183_s13 + $0x4] ss:$8 sps:$4 sm:$0xff]   ;;  %v4449_v16 = vld [vmem:[%s5183_s13] ss:$8 sps:$4 sm:$0xff]   ;;  %v4452_v17 = vld [vmem:[%s5183_s13 + $0x14] ss:$8 sps:$4 sm:$0xff]   ;;  %p5032_p0 = scmp.lt.s32.totalorder %s6224_s6, %s5030_s11 }
  0x1a   : > { %4042 = vmatprep.mubr.msk.bf16.mxu0 %vm1234_vm0, %v4451_v5  ;;  %v4454_v18 = vld [vmem:[%s5183_s13 + $0x10] ss:$8 sps:$4 sm:$0xff]   ;;  %v4455_v19 = vld [vmem:[%s5183_s13 + $0x24] ss:$8 sps:$4 sm:$0xff]   ;;  %v4457_v20 = vld [vmem:[%s5183_s13 + $0x20] ss:$8 sps:$4 sm:$0xff]  }
  0x1b   : > { %1441 = vmatpush1.bf16.msra.mxu0 %v4442_v4  ;;  %v4458_v21 = vld [vmem:[%s5183_s13 + $0x34] ss:$8 sps:$4 sm:$0xff]   ;;  %v4460_v22 = vld [vmem:[%s5183_s13 + $0x30] ss:$8 sps:$4 sm:$0xff]   ;;  %v4461_v23 = vld [vmem:[%s5183_s13 + $0x44] ss:$8 sps:$4 sm:$0xff]  }
  0x1c   : > { %1442 = vmatprep.subr.bf16.mxu0 %v5089_v1  ;;  %v4463_v24 = vld [vmem:[%s5183_s13 + $0x40] ss:$8 sps:$4 sm:$0xff]   ;;  %v4464_v25 = vld [vmem:[%s5183_s13 + $0x54] ss:$8 sps:$4 sm:$0xff]   ;;  %v4466_v26 = vld [vmem:[%s5183_s13 + $0x50] ss:$8 sps:$4 sm:$0xff]  }
  0x1d   : > { %v4467_v27 = vld [vmem:[%s5183_s13 + $0x64] ss:$8 sps:$4 sm:$0xff]   ;;  %v4469_v28 = vld [vmem:[%s5183_s13 + $0x60] ss:$8 sps:$4 sm:$0xff]   ;;  %v4470_v29 = vld [vmem:[%s5183_s13 + $0x74] ss:$8 sps:$4 sm:$0xff]  }
  0x1e   : > { %v4472_v30 = vld [vmem:[%s5183_s13 + $0x70] ss:$8 sps:$4 sm:$0xff]   ;;  %v4473_v31 = vld [vmem:[%s5183_s13 + $0x84] ss:$8 sps:$4 sm:$0xff]   ;;  %v4475_v32 = vld [vmem:[%s5183_s13 + $0x80] ss:$8 sps:$4 sm:$0xff]  }
  0x1f   : > { %1443 = vmatpush1.bf16.msra.mxu0 %v4443_v6  ;;  %v4476_v33 = vld [vmem:[%s5183_s13 + $0x94] ss:$8 sps:$4 sm:$0xff]   ;;  %v4478_v34 = vld [vmem:[%s5183_s13 + $0x90] ss:$8 sps:$4 sm:$0xff]   ;;  %v4479_v35 = vld [vmem:[%s5183_s13 + $0xa4] ss:$8 sps:$4 sm:$0xff]  }
  0x20   : > { %1444 = vmatprep.subr.bf16.mxu0 %v5089_v1  ;;  %v4481_v36 = vld [vmem:[%s5183_s13 + $0xa0] ss:$8 sps:$4 sm:$0xff]   ;;  %v4482_v37 = vld [vmem:[%s5183_s13 + $0xb4] ss:$8 sps:$4 sm:$0xff]   ;;  %v4484_v38 = vld [vmem:[%s5183_s13 + $0xb0] ss:$8 sps:$4 sm:$0xff]  }
  0x21   : > { %v4485_v39 = vld [vmem:[%s5183_s13 + $0xc4] ss:$8 sps:$4 sm:$0xff]   ;;  %v4487_v40 = vld [vmem:[%s5183_s13 + $0xc0] ss:$8 sps:$4 sm:$0xff]   ;;  %v4488_v41 = vld [vmem:[%s5183_s13 + $0xd4] ss:$8 sps:$4 sm:$0xff]  }
  0x22   : > { %v4490_v42 = vld [vmem:[%s5183_s13 + $0xd0] ss:$8 sps:$4 sm:$0xff]   ;;  %v4491_v43 = vld [vmem:[%s5183_s13 + $0xe4] ss:$8 sps:$4 sm:$0xff]   ;;  %v4493_v44 = vld [vmem:[%s5183_s13 + $0xe0] ss:$8 sps:$4 sm:$0xff]  }
  0x23   : > { %1445 = vmatpush1.bf16.msra.mxu0 %v4444_v7  ;;  %v4494_v45 = vld [vmem:[%s5183_s13 + $0xf4] ss:$8 sps:$4 sm:$0xff]   ;;  %v4496_v46 = vld [vmem:[%s5183_s13 + $0xf0] ss:$8 sps:$4 sm:$0xff]   ;;  %v4497_v47 = vld [vmem:[%s5183_s13 + $0x104] ss:$8 sps:$4 sm:$0xff]  }
  0x24   : > { %1446 = vmatprep.subr.bf16.mxu0 %v5089_v1  ;;  %v4499_v48 = vld [vmem:[%s5183_s13 + $0x100] ss:$8 sps:$4 sm:$0xff]   ;;  %v4500_v49 = vld [vmem:[%s5183_s13 + $0x114] ss:$8 sps:$4 sm:$0xff]   ;;  %v4502_v50 = vld [vmem:[%s5183_s13 + $0x110] ss:$8 sps:$4 sm:$0xff]  }
  0x25   : > { %v4503_v51 = vld [vmem:[%s5183_s13 + $0x124] ss:$8 sps:$4 sm:$0xff]   ;;  %v4505_v52 = vld [vmem:[%s5183_s13 + $0x120] ss:$8 sps:$4 sm:$0xff]   ;;  %v4506_v53 = vld [vmem:[%s5183_s13 + $0x134] ss:$8 sps:$4 sm:$0xff]  }
  0x26   : > { %v4508_v54 = vld [vmem:[%s5183_s13 + $0x130] ss:$8 sps:$4 sm:$0xff]   ;;  %v4509_v55 = vld [vmem:[%s5183_s13 + $0x144] ss:$8 sps:$4 sm:$0xff]   ;;  %v4511_v56 = vld [vmem:[%s5183_s13 + $0x140] ss:$8 sps:$4 sm:$0xff]  }
  0x27   : > { %1447 = vmatpush1.bf16.msra.mxu0 %v4445_v8  ;;  %v4512_v57 = vld [vmem:[%s5183_s13 + $0x154] ss:$8 sps:$4 sm:$0xff]   ;;  %v4514_v58 = vld [vmem:[%s5183_s13 + $0x150] ss:$8 sps:$4 sm:$0xff]   ;;  %v4515_v59 = vld [vmem:[%s5183_s13 + $0x164] ss:$8 sps:$4 sm:$0xff]  }
  0x28   : > { %1448 = vmatprep.subr.bf16.mxu0 %v5089_v1  ;;  %v4517_v60 = vld [vmem:[%s5183_s13 + $0x160] ss:$8 sps:$4 sm:$0xff]   ;;  %v4518_v61 = vld [vmem:[%s5183_s13 + $0x174] ss:$8 sps:$4 sm:$0xff]   ;;  %v4520_v62 = vld [vmem:[%s5183_s13 + $0x170] ss:$8 sps:$4 sm:$0xff]  }
  0x29   : > { %v4521_v63 = vld [vmem:[%s5183_s13 + $0x184] ss:$8 sps:$4 sm:$0xff]   ;;  %v4523_v0 = vld [vmem:[%s5183_s13 + $0x180] ss:$8 sps:$4 sm:$0xff]   ;;  %v4526_v2 = vld [vmem:[%s5183_s13 + $0x190] ss:$8 sps:$4 sm:$0xff]  }
  0x2a   : > { %v4527_v3 = vld [vmem:[%s5183_s13 + $0x1a4] ss:$8 sps:$4 sm:$0xff]   ;;  %v4529_v4 = vld [vmem:[%s5183_s13 + $0x1a0] ss:$8 sps:$4 sm:$0xff]   ;;  %v4530_v5 = vld [vmem:[%s5183_s13 + $0x1b4] ss:$8 sps:$4 sm:$0xff]  }
  0x2b   : > { %1449 = vmatpush1.bf16.msra.mxu0 %v4446_v9  ;;  %v4532_v8 = vld [vmem:[%s5183_s13 + $0x1b0] ss:$8 sps:$4 sm:$0xff]   ;;  %v4533_v10 = vld [vmem:[%s5183_s13 + $0x1c4] ss:$8 sps:$4 sm:$0xff]   ;;  %s5031_s12 = scalar_lea.vmem %s5030_s11, 256 }
  0x2c   : > { %1450 = vmatprep.subr.bf16.mxu0 %v5089_v1 }
  0x2f   : > { %1451 = vmatpush1.bf16.msra.mxu0 %v4447_v12 }
  0x30   : > { %1452 = vmatprep.subr.bf16.mxu0 %v5089_v1  ;;  %v4524_v1 = vld [vmem:[%s5183_s13 + $0x194] ss:$8 sps:$4 sm:$0xff]  }
  0x33   : > { %1453 = vmatpush1.bf16.msra.mxu0 %v1432_v15  ;;  %v4535_v15 = vld [vmem:[%s5183_s13 + $0x1c0] ss:$8 sps:$4 sm:$0xff]  }
  0x36   : > { %1467 = vmatmul.mubr.bf16.vlgmr.msra.gmra.mrb[0].mxu0 %v4449_v16 }
  0x37   : > { %4043 = vmatprep.mubr.msk.bf16.mxu0 %vm1234_vm0, %v4452_v17  ;;  %v4536_v17 = vld [vmem:[%s5183_s13 + $0x1d4] ss:$8 sps:$4 sm:$0xff]  }
  0x3e   : > { %1475 = vmatmul.mubr.bf16.gmra.mrb[4].mxu0 %v4454_v18 }
  0x3f   : > { %4044 = vmatprep.mubr.msk.bf16.mxu0 %vm1234_vm0, %v4455_v19 }
  0x46   : > { %1483 = vmatmul.mubr.bf16.gmra.mrb[8].mxu0 %v4457_v20 }
  0x47   : > { %4045 = vmatprep.mubr.msk.bf16.mxu0 %vm1234_vm0, %v4458_v21 }
  0x4e   : > { %1491 = vmatmul.mubr.bf16.gmra.mrb[12].mxu0 %v4460_v22  ;;  %v4538_v22 = vld [vmem:[%s5183_s13 + $0x1d0] ss:$8 sps:$4 sm:$0xff]  }
  0x4f   : > { %4046 = vmatprep.mubr.msk.bf16.mxu0 %vm1234_vm0, %v4461_v23 }
  0x56   : > { %1499 = vmatmul.mubr.bf16.gmra.mrb[16].mxu0 %v4463_v24  ;;  %v4539_v24 = vld [vmem:[%s5183_s13 + $0x1e4] ss:$8 sps:$4 sm:$0xff]  }
  0x57   : > { %4047 = vmatprep.mubr.msk.bf16.mxu0 %vm1234_vm0, %v4464_v25 }
  0x5e   : > { %1507 = vmatmul.mubr.bf16.gmra.mrb[20].mxu0 %v4466_v26 }
  0x5f   : > { %4048 = vmatprep.mubr.msk.bf16.mxu0 %vm1234_vm0, %v4467_v27 }
  0x66   : > { %1515 = vmatmul.mubr.bf16.gmra.mrb[24].mxu0 %v4469_v28 }
  0x67   : > { %4049 = vmatprep.mubr.msk.bf16.mxu0 %vm1234_vm0, %v4470_v29  ;;  %v4541_v29 = vld [vmem:[%s5183_s13 + $0x1e0] ss:$8 sps:$4 sm:$0xff]  }
  0x6e   : > { %1523 = vmatmul.mubr.bf16.gmra.mrb[28].mxu0 %v4472_v30 }
  0x6f   : > { %4050 = vmatprep.mubr.msk.bf16.mxu0 %vm1234_vm0, %v4473_v31  ;;  %v4542_v31 = vld [vmem:[%s5183_s13 + $0x1f4] ss:$8 sps:$4 sm:$0xff]  }
  0x76   : > { %1531 = vmatmul.mubr.bf16.gmra.mrb[32].mxu0 %v4475_v32 }
  0x77   : > { %4051 = vmatprep.mubr.msk.bf16.mxu0 %vm1234_vm0, %v4476_v33 }
  0x7e   : > { %1539 = vmatmul.mubr.bf16.gmra.mrb[36].mxu0 %v4478_v34 }
  0x7f   : > { %4052 = vmatprep.mubr.msk.bf16.mxu0 %vm1234_vm0, %v4479_v35 }
  0x86   : > { %1547 = vmatmul.mubr.bf16.gmra.mrb[40].mxu0 %v4481_v36  ;;  %v4544_v36 = vld [vmem:[%s5183_s13 + $0x1f0] ss:$8 sps:$4 sm:$0xff]  }
  0x87   : > { %4053 = vmatprep.mubr.msk.bf16.mxu0 %vm1234_vm0, %v4482_v37 }
  0x8e   : > { %1555 = vmatmul.mubr.bf16.gmra.mrb[44].mxu0 %v4484_v38  ;;  %v4545_v38 = vld [vmem:[%s5183_s13 + $0x204] ss:$8 sps:$4 sm:$0xff]  }
  0x8f   : > { %4054 = vmatprep.mubr.msk.bf16.mxu0 %vm1234_vm0, %v4485_v39 }
  0x96   : > { %1563 = vmatmul.mubr.bf16.gmra.mrb[48].mxu0 %v4487_v40 }
  0x97   : > { %4055 = vmatprep.mubr.msk.bf16.mxu0 %vm1234_vm0, %v4488_v41 }
  0x9e   : > { %1571 = vmatmul.mubr.bf16.gmra.mrb[52].mxu0 %v4490_v42 }
  0x9f   : > { %4056 = vmatprep.mubr.msk.bf16.mxu0 %vm1234_vm0, %v4491_v43  ;;  %v4547_v43 = vld [vmem:[%s5183_s13 + $0x200] ss:$8 sps:$4 sm:$0xff]  }
  0xa6   : > { %1579 = vmatmul.mubr.bf16.gmra.mrb[56].mxu0 %v4493_v44 }
  0xa7   : > { %4057 = vmatprep.mubr.msk.bf16.mxu0 %vm1234_vm0, %v4494_v45  ;;  %v4548_v45 = vld [vmem:[%s5183_s13 + $0x214] ss:$8 sps:$4 sm:$0xff]  }
  0xae   : > { %1587 = vmatmul.mubr.bf16.gmra.mrb[60].mxu0 %v4496_v46 }
  0xaf   : > { %4058 = vmatprep.mubr.msk.bf16.mxu0 %vm1234_vm0, %v4497_v47 }
  0xb6   : > { %1595 = vmatmul.mubr.bf16.gmra.mrb[64].mxu0 %v4499_v48 }
  0xb7   : > { %4059 = vmatprep.mubr.msk.bf16.mxu0 %vm1234_vm0, %v4500_v49 }
  0xbe   : > { %1603 = vmatmul.mubr.bf16.gmra.mrb[68].mxu0 %v4502_v50  ;;  %v4550_v50 = vld [vmem:[%s5183_s13 + $0x210] ss:$8 sps:$4 sm:$0xff]  }
  0xbf   : > { %4060 = vmatprep.mubr.msk.bf16.mxu0 %vm1234_vm0, %v4503_v51 }
  0xc6   : > { %1611 = vmatmul.mubr.bf16.gmra.mrb[72].mxu0 %v4505_v52  ;;  %v4551_v52 = vld [vmem:[%s5183_s13 + $0x224] ss:$8 sps:$4 sm:$0xff]  }
  0xc7   : > { %4061 = vmatprep.mubr.msk.bf16.mxu0 %vm1234_vm0, %v4506_v53 }
  0xce   : > { %1619 = vmatmul.mubr.bf16.gmra.mrb[76].mxu0 %v4508_v54 }
  0xcf   : > { %4062 = vmatprep.mubr.msk.bf16.mxu0 %vm1234_vm0, %v4509_v55 }
  0xd6   : > { %1627 = vmatmul.mubr.bf16.gmra.mrb[80].mxu0 %v4511_v56 }
  0xd7   : > { %4063 = vmatprep.mubr.msk.bf16.mxu0 %vm1234_vm0, %v4512_v57  ;;  %v4553_v57 = vld [vmem:[%s5183_s13 + $0x220] ss:$8 sps:$4 sm:$0xff]  }
  0xde   : > { %1635 = vmatmul.mubr.bf16.gmra.mrb[84].mxu0 %v4514_v58 }
  0xdf   : > { %4064 = vmatprep.mubr.msk.bf16.mxu0 %vm1234_vm0, %v4515_v59  ;;  %v4554_v59 = vld [vmem:[%s5183_s13 + $0x234] ss:$8 sps:$4 sm:$0xff]  }
  0xe6   : > { %1643 = vmatmul.mubr.bf16.gmra.mrb[88].mxu0 %v4517_v60 }
  0xe7   : > { %4065 = vmatprep.mubr.msk.bf16.mxu0 %vm1234_vm0, %v4518_v61 }
  0xee   : > { %1651 = vmatmul.mubr.bf16.gmra.mrb[92].mxu0 %v4520_v62 }
  0xef   : > { %4066 = vmatprep.mubr.msk.bf16.mxu0 %vm1234_vm0, %v4521_v63 }
  0xf6   : > { %1659 = vmatmul.mubr.bf16.gmra.mrb[96].mxu0 %v4523_v0  ;;  %v4556_v0 = vld [vmem:[%s5183_s13 + $0x230] ss:$8 sps:$4 sm:$0xff]  }
  0xf7   : > { %4067 = vmatprep.mubr.msk.bf16.mxu0 %vm1234_vm0, %v4524_v1 }
  0xfe   : > { %1667 = vmatmul.mubr.bf16.gmra.mrb[100].mxu0 %v4526_v2  ;;  %v4557_v2 = vld [vmem:[%s5183_s13 + $0x244] ss:$8 sps:$4 sm:$0xff]  }
  0xff   : > { %4068 = vmatprep.mubr.msk.bf16.mxu0 %vm1234_vm0, %v4527_v3 }
 0x106   : > { %1675 = vmatmul.mubr.bf16.gmra.mrb[104].mxu0 %v4529_v4 }
 0x107   : > { %4069 = vmatprep.mubr.msk.bf16.mxu0 %vm1234_vm0, %v4530_v5 }
 0x109   : > { %v1468_v6 = vpop.f32.mrb[0].mxu0 }
 0x10a   : > { %v1470_v7 = vpop.f32.mrb[1].mxu0 }
 0x10b   : > { %v1471_v9 = vpop.f32.mrb[2].mxu0  ;;  %v4559_v7 = vld [vmem:[%s5183_s13 + $0x240] ss:$8 sps:$4 sm:$0xff]  }
 0x10c   : > { %v1473_v11 = vpop.f32.mrb[3].mxu0  ;;  %v1979_v12 = vpack.c.bf16 %v1471_v9, %v1468_v6  ;;  %v4560_v9 = vld [vmem:[%s5183_s13 + $0x254] ss:$8 sps:$4 sm:$0xff]  }
 0x10e   : > { %1683 = vmatmul.mubr.bf16.gmra.mrb[108].mxu0 %v4532_v8  ;;  %2064 = vxpose.xlu1.c.b16.start [1/8] (narrow) %v1979_v12, 16 }
 0x10f   : > { %4070 = vmatprep.mubr.msk.bf16.mxu0 %vm1234_vm0, %v4533_v10 }
 0x111   : > { %v1476_v13 = vpop.f32.mrb[4].mxu0 }
 0x112   : > { %v1478_v14 = vpop.f32.mrb[5].mxu0 }
 0x113   : > { %v1479_v16 = vpop.f32.mrb[6].mxu0  ;;  %v4562_v14 = vld [vmem:[%s5183_s13 + $0x250] ss:$8 sps:$4 sm:$0xff]  }
 0x114   : > { %v1980_v18 = vpack.c.bf16 %v1479_v16, %v1476_v13  ;;  %v1481_v19 = vpop.f32.mrb[7].mxu0  ;;  %v4563_v16 = vld [vmem:[%s5183_s13 + $0x264] ss:$8 sps:$4 sm:$0xff]  }
 0x116   : > { %1691 = vmatmul.mubr.bf16.gmra.mrb[112].mxu0 %v4535_v15  ;;  %2065 = vxpose.xlu1.c.b16.cont [2/8] (narrow) %v1980_v18, 16 }
 0x117   : > { %4071 = vmatprep.mubr.msk.bf16.mxu0 %vm1234_vm0, %v4536_v17 }
 0x119   : > { %v1484_v20 = vpop.f32.mrb[8].mxu0 }
 0x11a   : > { %v1486_v21 = vpop.f32.mrb[9].mxu0 }
 0x11b   : > { %v1487_v23 = vpop.f32.mrb[10].mxu0  ;;  %v4565_v21 = vld [vmem:[%s5183_s13 + $0x260] ss:$8 sps:$4 sm:$0xff]  }
 0x11c   : > { %v1981_v25 = vpack.c.bf16 %v1487_v23, %v1484_v20  ;;  %v1489_v26 = vpop.f32.mrb[11].mxu0  ;;  %v4566_v23 = vld [vmem:[%s5183_s13 + $0x274] ss:$8 sps:$4 sm:$0xff]  }
 0x11e   : > { %1699 = vmatmul.mubr.bf16.gmra.mrb[116].mxu0 %v4538_v22  ;;  %2066 = vxpose.xlu1.c.b16.cont [3/8] (narrow) %v1981_v25, 16 }
 0x11f   : > { %4072 = vmatprep.mubr.msk.bf16.mxu0 %vm1234_vm0, %v4539_v24 }
 0x121   : > { %v1492_v27 = vpop.f32.mrb[12].mxu0 }
 0x122   : > { %v1494_v28 = vpop.f32.mrb[13].mxu0 }
 0x123   : > { %v1495_v30 = vpop.f32.mrb[14].mxu0  ;;  %v4568_v28 = vld [vmem:[%s5183_s13 + $0x270] ss:$8 sps:$4 sm:$0xff]  }
 0x124   : > { %v1982_v32 = vpack.c.bf16 %v1495_v30, %v1492_v27  ;;  %v1497_v33 = vpop.f32.mrb[15].mxu0  ;;  %v4569_v30 = vld [vmem:[%s5183_s13 + $0x284] ss:$8 sps:$4 sm:$0xff]  }
 0x126   : > { %1707 = vmatmul.mubr.bf16.gmra.mrb[120].mxu0 %v4541_v29  ;;  %2067 = vxpose.xlu1.c.b16.cont [4/8] (narrow) %v1982_v32, 16 }
 0x127   : > { %4073 = vmatprep.mubr.msk.bf16.mxu0 %vm1234_vm0, %v4542_v31 }
 0x129   : > { %v1500_v34 = vpop.f32.mrb[16].mxu0 }
 0x12a   : > { %v1502_v35 = vpop.f32.mrb[17].mxu0 }
 0x12b   : > { %v1503_v37 = vpop.f32.mrb[18].mxu0  ;;  %v4571_v35 = vld [vmem:[%s5183_s13 + $0x280] ss:$8 sps:$4 sm:$0xff]  }
 0x12c   : > { %v1983_v39 = vpack.c.bf16 %v1503_v37, %v1500_v34  ;;  %v1505_v40 = vpop.f32.mrb[19].mxu0  ;;  %v4572_v37 = vld [vmem:[%s5183_s13 + $0x294] ss:$8 sps:$4 sm:$0xff]  }
 0x12e   : > { %1715 = vmatmul.mubr.bf16.gmra.mrb[124].mxu0 %v4544_v36  ;;  %2068 = vxpose.xlu1.c.b16.cont [5/8] (narrow) %v1983_v39, 16 }
 0x12f   : > { %4074 = vmatprep.mubr.msk.bf16.mxu0 %vm1234_vm0, %v4545_v38 }
 0x131   : > { %v1508_v41 = vpop.f32.mrb[20].mxu0 }
 0x132   : > { %v1510_v42 = vpop.f32.mrb[21].mxu0 }
 0x133   : > { %v1511_v44 = vpop.f32.mrb[22].mxu0  ;;  %v4574_v42 = vld [vmem:[%s5183_s13 + $0x290] ss:$8 sps:$4 sm:$0xff]  }
 0x134   : > { %v1984_v46 = vpack.c.bf16 %v1511_v44, %v1508_v41  ;;  %v1513_v47 = vpop.f32.mrb[23].mxu0  ;;  %v4575_v44 = vld [vmem:[%s5183_s13 + $0x2a4] ss:$8 sps:$4 sm:$0xff]  }
 0x136   : > { %1723 = vmatmul.mubr.bf16.gmra.mrb[128].mxu0 %v4547_v43  ;;  %2069 = vxpose.xlu1.c.b16.cont [6/8] (narrow) %v1984_v46, 16 }
 0x137   : > { %4075 = vmatprep.mubr.msk.bf16.mxu0 %vm1234_vm0, %v4548_v45 }
 0x139   : > { %v1516_v48 = vpop.f32.mrb[24].mxu0 }
 0x13a   : > { %v1518_v49 = vpop.f32.mrb[25].mxu0 }
 0x13b   : > { %v1519_v51 = vpop.f32.mrb[26].mxu0  ;;  %v4577_v49 = vld [vmem:[%s5183_s13 + $0x2a0] ss:$8 sps:$4 sm:$0xff]  }
 0x13c   : > { %v1985_v53 = vpack.c.bf16 %v1519_v51, %v1516_v48  ;;  %v1521_v54 = vpop.f32.mrb[27].mxu0  ;;  %v4578_v51 = vld [vmem:[%s5183_s13 + $0x2b4] ss:$8 sps:$4 sm:$0xff]  }
 0x13e   : > { %1731 = vmatmul.mubr.bf16.gmra.mrb[132].mxu0 %v4550_v50  ;;  %2070 = vxpose.xlu1.c.b16.cont [7/8] (narrow) %v1985_v53, 16 }
 0x13f   : > { %4076 = vmatprep.mubr.msk.bf16.mxu0 %vm1234_vm0, %v4551_v52 }
 0x141   : > { %v1524_v55 = vpop.f32.mrb[28].mxu0 }
 0x142   : > { %v1526_v56 = vpop.f32.mrb[29].mxu0 }
 0x143   : > { %v1527_v58 = vpop.f32.mrb[30].mxu0  ;;  %v4580_v56 = vld [vmem:[%s5183_s13 + $0x2b0] ss:$8 sps:$4 sm:$0xff]  }
 0x144   : > { %v1986_v60 = vpack.c.bf16 %v1527_v58, %v1524_v55  ;;  %v1529_v61 = vpop.f32.mrb[31].mxu0  ;;  %v4581_v58 = vld [vmem:[%s5183_s13 + $0x2c4] ss:$8 sps:$4 sm:$0xff]  }
 0x146   : > { %1739 = vmatmul.mubr.bf16.gmra.mrb[136].mxu0 %v4553_v57  ;;  %2071 = vxpose.xlu1.c.b16.end [8/8] (narrow) %v1986_v60, 16 }
 0x147   : > { %4077 = vmatprep.mubr.msk.bf16.mxu0 %vm1234_vm0, %v4554_v59 }
 0x149   : > { %v1532_v62 = vpop.f32.mrb[32].mxu0 }
 0x14a   : > { %v1534_v63 = vpop.f32.mrb[33].mxu0 }
 0x14b   : > { %v1535_v1 = vpop.f32.mrb[34].mxu0  ;;  %v4583_v63 = vld [vmem:[%s5183_s13 + $0x2c0] ss:$8 sps:$4 sm:$0xff]  }
 0x14c   : > { %v1537_v3 = vpop.f32.mrb[35].mxu0  ;;  %v1987_v4 = vpack.c.bf16 %v1535_v1, %v1532_v62  ;;  %v4584_v1 = vld [vmem:[%s5183_s13 + $0x2d4] ss:$8 sps:$4 sm:$0xff]  }
 0x14e   : > { %1747 = vmatmul.mubr.bf16.gmra.mrb[140].mxu0 %v4556_v0  ;;  %2080 = vxpose.xlu0.c.b16.start [1/8] (narrow) %v1987_v4, 16 }
 0x14f   : > { %4078 = vmatprep.mubr.msk.bf16.mxu0 %vm1234_vm0, %v4557_v2 }
 0x151   : > { %v1540_v5 = vpop.f32.mrb[36].mxu0 }
 0x152   : > { %v1542_v6 = vpop.f32.mrb[37].mxu0 }
 0x153   : > { %v1543_v8 = vpop.f32.mrb[38].mxu0  ;;  %v4586_v6 = vld [vmem:[%s5183_s13 + $0x2d0] ss:$8 sps:$4 sm:$0xff]  }
 0x154   : > { %v1988_v10 = vpack.c.bf16 %v1543_v8, %v1540_v5  ;;  %v1545_v11 = vpop.f32.mrb[39].mxu0  ;;  %v4587_v8 = vld [vmem:[%s5183_s13 + $0x2e4] ss:$8 sps:$4 sm:$0xff]  }
 0x156   : > { %1755 = vmatmul.mubr.bf16.gmra.mrb[144].mxu0 %v4559_v7  ;;  %2081 = vxpose.xlu0.c.b16.cont [2/8] (narrow) %v1988_v10, 16 }
 0x157   : > { %4079 = vmatprep.mubr.msk.bf16.mxu0 %vm1234_vm0, %v4560_v9 }
 0x159   : > { %v1548_v12 = vpop.f32.mrb[40].mxu0 }
 0x15a   : > { %v1550_v13 = vpop.f32.mrb[41].mxu0 }
 0x15b   : > { %v1551_v15 = vpop.f32.mrb[42].mxu0  ;;  %v4589_v13 = vld [vmem:[%s5183_s13 + $0x2e0] ss:$8 sps:$4 sm:$0xff]  }
 0x15c   : > { %v1989_v17 = vpack.c.bf16 %v1551_v15, %v1548_v12  ;;  %v1553_v18 = vpop.f32.mrb[43].mxu0  ;;  %v4590_v15 = vld [vmem:[%s5183_s13 + $0x2f4] ss:$8 sps:$4 sm:$0xff]  }
 0x15e   : > { %1763 = vmatmul.mubr.bf16.gmra.mrb[148].mxu0 %v4562_v14  ;;  %2082 = vxpose.xlu0.c.b16.cont [3/8] (narrow) %v1989_v17, 16 }
 0x15f   : > { %4080 = vmatprep.mubr.msk.bf16.mxu0 %vm1234_vm0, %v4563_v16 }
 0x161   : > { %v1556_v19 = vpop.f32.mrb[44].mxu0 }
 0x162   : > { %v1558_v20 = vpop.f32.mrb[45].mxu0 }
 0x163   : > { %v1559_v22 = vpop.f32.mrb[46].mxu0  ;;  %v4592_v20 = vld [vmem:[%s5183_s13 + $0x2f0] ss:$8 sps:$4 sm:$0xff]  }
 0x164   : > { %v1990_v24 = vpack.c.bf16 %v1559_v22, %v1556_v19  ;;  %v1561_v25 = vpop.f32.mrb[47].mxu0  ;;  %v4593_v22 = vld [vmem:[%s5183_s13 + $0x304] ss:$8 sps:$4 sm:$0xff]  }
 0x166   : > { %1771 = vmatmul.mubr.bf16.gmra.mrb[152].mxu0 %v4565_v21  ;;  %2083 = vxpose.xlu0.c.b16.cont [4/8] (narrow) %v1990_v24, 16 }
 0x167   : > { %4081 = vmatprep.mubr.msk.bf16.mxu0 %vm1234_vm0, %v4566_v23 }
 0x169   : > { %v1564_v26 = vpop.f32.mrb[48].mxu0 }
 0x16a   : > { %v1566_v27 = vpop.f32.mrb[49].mxu0 }
 0x16b   : > { %v1567_v29 = vpop.f32.mrb[50].mxu0  ;;  %v4595_v27 = vld [vmem:[%s5183_s13 + $0x300] ss:$8 sps:$4 sm:$0xff]  }
 0x16c   : > { %v1991_v31 = vpack.c.bf16 %v1567_v29, %v1564_v26  ;;  %v1569_v32 = vpop.f32.mrb[51].mxu0  ;;  %v4596_v29 = vld [vmem:[%s5183_s13 + $0x314] ss:$8 sps:$4 sm:$0xff]  }
 0x16e   : > { %1779 = vmatmul.mubr.bf16.gmra.mrb[156].mxu0 %v4568_v28  ;;  %2084 = vxpose.xlu0.c.b16.cont [5/8] (narrow) %v1991_v31, 16 }
 0x16f   : > { %4082 = vmatprep.mubr.msk.bf16.mxu0 %vm1234_vm0, %v4569_v30 }
 0x171   : > { %v1572_v33 = vpop.f32.mrb[52].mxu0 }
 0x172   : > { %v1574_v34 = vpop.f32.mrb[53].mxu0 }
 0x173   : > { %v1575_v36 = vpop.f32.mrb[54].mxu0  ;;  %v4598_v34 = vld [vmem:[%s5183_s13 + $0x310] ss:$8 sps:$4 sm:$0xff]  }
 0x174   : > { %v1992_v38 = vpack.c.bf16 %v1575_v36, %v1572_v33  ;;  %v1577_v39 = vpop.f32.mrb[55].mxu0  ;;  %v4599_v36 = vld [vmem:[%s5183_s13 + $0x324] ss:$8 sps:$4 sm:$0xff]  }
 0x176   : > { %1787 = vmatmul.mubr.bf16.gmra.mrb[160].mxu0 %v4571_v35  ;;  %2085 = vxpose.xlu0.c.b16.cont [6/8] (narrow) %v1992_v38, 16 }
 0x177   : > { %4083 = vmatprep.mubr.msk.bf16.mxu0 %vm1234_vm0, %v4572_v37 }
 0x179   : > { %v1580_v40 = vpop.f32.mrb[56].mxu0 }
 0x17a   : > { %v1582_v41 = vpop.f32.mrb[57].mxu0 }
 0x17b   : > { %v1583_v43 = vpop.f32.mrb[58].mxu0  ;;  %v4601_v41 = vld [vmem:[%s5183_s13 + $0x320] ss:$8 sps:$4 sm:$0xff]  }
 0x17c   : > { %v1993_v45 = vpack.c.bf16 %v1583_v43, %v1580_v40  ;;  %v1585_v46 = vpop.f32.mrb[59].mxu0  ;;  %v4602_v43 = vld [vmem:[%s5183_s13 + $0x334] ss:$8 sps:$4 sm:$0xff]  }
 0x17e   : > { %1795 = vmatmul.mubr.bf16.gmra.mrb[164].mxu0 %v4574_v42  ;;  %2086 = vxpose.xlu0.c.b16.cont [7/8] (narrow) %v1993_v45, 16 }
 0x17f   : > { %4084 = vmatprep.mubr.msk.bf16.mxu0 %vm1234_vm0, %v4575_v44 }
 0x181   : > { %v1588_v47 = vpop.f32.mrb[60].mxu0 }
 0x182   : > { %v1590_v48 = vpop.f32.mrb[61].mxu0 }
 0x183   : > { %v1591_v50 = vpop.f32.mrb[62].mxu0  ;;  %v4604_v48 = vld [vmem:[%s5183_s13 + $0x330] ss:$8 sps:$4 sm:$0xff]  }
 0x184   : > { %v1994_v52 = vpack.c.bf16 %v1591_v50, %v1588_v47  ;;  %v1593_v53 = vpop.f32.mrb[63].mxu0  ;;  %v4605_v50 = vld [vmem:[%s5183_s13 + $0x344] ss:$8 sps:$4 sm:$0xff]  }
 0x185   : > { %v4641_v53 = vld [vmem:[%s6266_s2 + $0x4] ss:$16 sps:$4 sm:$0xff]  }
 0x186   : > { %1803 = vmatmul.mubr.bf16.gmra.mrb[168].mxu0 %v4577_v49  ;;  %2087 = vxpose.xlu0.c.b16.end [8/8] (narrow) %v1994_v52, 16 }
 0x187   : > { %4085 = vmatprep.mubr.msk.bf16.mxu0 %vm1234_vm0, %v4578_v51  ;;  %3472 = vmatprep.subr.bf16.mxu1 %v4641_v53 }
 0x189   : > { %v1596_v54 = vpop.f32.mrb[64].mxu0 }
 0x18a   : > { %v1598_v55 = vpop.f32.mrb[65].mxu0 }
 0x18b   : > { %v1599_v57 = vpop.f32.mrb[66].mxu0 }
 0x18c   : > { %v1995_v59 = vpack.c.bf16 %v1599_v57, %v1596_v54  ;;  %v1601_v60 = vpop.f32.mrb[67].mxu0  ;;  %v4643_v54 = vld [vmem:[%s6266_s2] ss:$16 sps:$4 sm:$0xff]  }
 0x18d   : > { %v4607_v57 = vld [vmem:[%s5183_s13 + $0x340] ss:$8 sps:$4 sm:$0xff]   ;;  %3473 = vmatpush1.bf16.msra.mxu1 %v4643_v54  ;;  %v4644_v60 = vld [vmem:[%s6266_s2 + $0x24] ss:$16 sps:$4 sm:$0xff]  }
 0x18e   : > { %1811 = vmatmul.mubr.bf16.gmra.mrb[172].mxu0 %v4580_v56  ;;  %2096 = vxpose.xlu1.c.b16.start [1/8] (narrow) %v1995_v59, 16  ;;  %v4608_v59 = vld [vmem:[%s5183_s13 + $0x354] ss:$8 sps:$4 sm:$0xff]   ;;  %v4676_v54 = vld [vmem:[%s6266_s2 + $0x160] ss:$16 sps:$4 sm:$0xff]  }
 0x18f   : > { %4086 = vmatprep.mubr.msk.bf16.mxu0 %vm1234_vm0, %v4581_v58  ;;  %3474 = vmatprep.subr.bf16.mxu1 %v4644_v60 }
 0x191   : > { %v1604_v61 = vpop.f32.mrb[68].mxu0 }
 0x192   : > { %v1606_v62 = vpop.f32.mrb[69].mxu0 }
 0x193   : > { %v1607_v0 = vpop.f32.mrb[70].mxu0 }
 0x194   : > { %v1996_v2 = vpack.c.bf16 %v1607_v0, %v1604_v61  ;;  %v1609_v3 = vpop.f32.mrb[71].mxu0  ;;  %v4647_v0 = vld [vmem:[%s6266_s2 + $0x44] ss:$16 sps:$4 sm:$0xff]  }
 0x196   : > { %1819 = vmatmul.mubr.bf16.gmra.mrb[176].mxu0 %v4583_v63  ;;  %2097 = vxpose.xlu1.c.b16.cont [2/8] (narrow) %v1996_v2, 16  ;;  %v4646_v63 = vld [vmem:[%s6266_s2 + $0x20] ss:$16 sps:$4 sm:$0xff]  }
 0x197   : > { %4087 = vmatprep.mubr.msk.bf16.mxu0 %vm1234_vm0, %v4584_v1  ;;  %3475 = vmatpush1.bf16.msra.mxu1 %v4646_v63  ;;  %v4649_v1 = vld [vmem:[%s6266_s2 + $0x40] ss:$16 sps:$4 sm:$0xff]  }
 0x198   : > { %3476 = vmatprep.subr.bf16.mxu1 %v4647_v0 }
 0x199   : > { %v1612_v4 = vpop.f32.mrb[72].mxu0 }
 0x19a   : > { %v1614_v5 = vpop.f32.mrb[73].mxu0 }
 0x19b   : > { %v1615_v7 = vpop.f32.mrb[74].mxu0  ;;  %3477 = vmatpush1.bf16.msra.mxu1 %v4649_v1  ;;  %v4682_v1 = vld [vmem:[%s6266_s2 + $0x1a0] ss:$16 sps:$4 sm:$0xff]  }
 0x19c   : > { %v1997_v9 = vpack.c.bf16 %v1615_v7, %v1612_v4  ;;  %v1617_v10 = vpop.f32.mrb[75].mxu0  ;;  %v4610_v4 = vld [vmem:[%s5183_s13 + $0x350] ss:$8 sps:$4 sm:$0xff]   ;;  %v4650_v7 = vld [vmem:[%s6266_s2 + $0x64] ss:$16 sps:$4 sm:$0xff]  }
 0x19d   : > { %v4652_v10 = vld [vmem:[%s6266_s2 + $0x60] ss:$16 sps:$4 sm:$0xff]   ;;  %3478 = vmatprep.subr.bf16.mxu1 %v4650_v7 }
 0x19e   : > { %1827 = vmatmul.mubr.bf16.gmra.mrb[180].mxu0 %v4586_v6  ;;  %2098 = vxpose.xlu1.c.b16.cont [3/8] (narrow) %v1997_v9, 16  ;;  %v4611_v6 = vld [vmem:[%s5183_s13 + $0x364] ss:$8 sps:$4 sm:$0xff]  }
 0x19f   : > { %4088 = vmatprep.mubr.msk.bf16.mxu0 %vm1234_vm0, %v4587_v8  ;;  %3479 = vmatpush1.bf16.msra.mxu1 %v4652_v10 }
 0x1a1   : > { %v1620_v11 = vpop.f32.mrb[76].mxu0 }
 0x1a2   : > { %v1622_v12 = vpop.f32.mrb[77].mxu0 }
 0x1a3   : > { %v1623_v14 = vpop.f32.mrb[78].mxu0  ;;  %v4655_v12 = vld [vmem:[%s6266_s2 + $0x80] ss:$16 sps:$4 sm:$0xff]  }
 0x1a4   : > { %v1998_v16 = vpack.c.bf16 %v1623_v14, %v1620_v11  ;;  %v1625_v17 = vpop.f32.mrb[79].mxu0  ;;  %v4653_v11 = vld [vmem:[%s6266_s2 + $0x84] ss:$16 sps:$4 sm:$0xff]  }
 0x1a5   : > { %3480 = vmatprep.subr.bf16.mxu1 %v4653_v11  ;;  %v4614_v17 = vld [vmem:[%s5183_s13 + $0x374] ss:$8 sps:$4 sm:$0xff]  }
 0x1a6   : > { %1835 = vmatmul.mubr.bf16.gmra.mrb[184].mxu0 %v4589_v13  ;;  %2099 = vxpose.xlu1.c.b16.cont [4/8] (narrow) %v1998_v16, 16 }
 0x1a7   : > { %4089 = vmatprep.mubr.msk.bf16.mxu0 %vm1234_vm0, %v4590_v15  ;;  %v4613_v15 = vld [vmem:[%s5183_s13 + $0x360] ss:$8 sps:$4 sm:$0xff]   ;;  %3481 = vmatpush1.bf16.msra.mxu1 %v4655_v12 }
 0x1a8   : > { %v4688_v12 = vld [vmem:[%s6266_s2 + $0x1e0] ss:$16 sps:$4 sm:$0xff]  }
 0x1a9   : > { %v1628_v18 = vpop.f32.mrb[80].mxu0 }
 0x1aa   : > { %v1630_v19 = vpop.f32.mrb[81].mxu0 }
 0x1ab   : > { %v1631_v21 = vpop.f32.mrb[82].mxu0 }
 0x1ac   : > { %v1999_v23 = vpack.c.bf16 %v1631_v21, %v1628_v18  ;;  %v1633_v24 = vpop.f32.mrb[83].mxu0  ;;  %v4656_v18 = vld [vmem:[%s6266_s2 + $0xa4] ss:$16 sps:$4 sm:$0xff]   ;;  %v4658_v21 = vld [vmem:[%s6266_s2 + $0xa0] ss:$16 sps:$4 sm:$0xff]  }
 0x1ad   : > { %3482 = vmatprep.subr.bf16.mxu1 %v4656_v18 }
 0x1ae   : > { %1843 = vmatmul.mubr.bf16.gmra.mrb[188].mxu0 %v4592_v20  ;;  %2100 = vxpose.xlu1.c.b16.cont [5/8] (narrow) %v1999_v23, 16  ;;  %v4661_v23 = vld [vmem:[%s6266_s2 + $0xc0] ss:$16 sps:$4 sm:$0xff]  }
 0x1af   : > { %4090 = vmatprep.mubr.msk.bf16.mxu0 %vm1234_vm0, %v4593_v22  ;;  %3483 = vmatpush1.bf16.msra.mxu1 %v4658_v21  ;;  %v4659_v22 = vld [vmem:[%s6266_s2 + $0xc4] ss:$16 sps:$4 sm:$0xff]  }
 0x1b0   : > { %3484 = vmatprep.subr.bf16.mxu1 %v4659_v22  ;;  %v4632_v21 = vld [vmem:[%s5183_s13 + $0x3d4] ss:$8 sps:$4 sm:$0xff]  }
 0x1b1   : > { %v1636_v25 = vpop.f32.mrb[84].mxu0  ;;  %v4694_v22 = vld [vmem:[%s6266_s2 + $0x224] ss:$16 sps:$4 sm:$0xff]  }
 0x1b2   : > { %v1638_v26 = vpop.f32.mrb[85].mxu0 }
 0x1b3   : > { %v1639_v28 = vpop.f32.mrb[86].mxu0  ;;  %v4616_v26 = vld [vmem:[%s5183_s13 + $0x370] ss:$8 sps:$4 sm:$0xff]   ;;  %3485 = vmatpush1.bf16.msra.mxu1 %v4661_v23 }
 0x1b4   : > { %v2000_v30 = vpack.c.bf16 %v1639_v28, %v1636_v25  ;;  %v1641_v31 = vpop.f32.mrb[87].mxu0  ;;  %v4617_v28 = vld [vmem:[%s5183_s13 + $0x384] ss:$8 sps:$4 sm:$0xff]  }
 0x1b6   : > { %1851 = vmatmul.mubr.bf16.gmra.mrb[192].mxu0 %v4595_v27  ;;  %2101 = vxpose.xlu1.c.b16.cont [6/8] (narrow) %v2000_v30, 16 }
 0x1b7   : > { %4091 = vmatprep.mubr.msk.bf16.mxu0 %vm1234_vm0, %v4596_v29  ;;  %v4662_v29 = vld [vmem:[%s6266_s2 + $0xe4] ss:$16 sps:$4 sm:$0xff]  }
 0x1b8   : > { %3486 = vmatprep.subr.bf16.mxu1 %v4662_v29 }
 0x1b9   : > { %v1644_v32 = vpop.f32.mrb[88].mxu0 }
 0x1ba   : > { %v1646_v33 = vpop.f32.mrb[89].mxu0 }
 0x1bb   : > { %v1647_v35 = vpop.f32.mrb[90].mxu0  ;;  %v4665_v33 = vld [vmem:[%s6266_s2 + $0x104] ss:$16 sps:$4 sm:$0xff]  }
 0x1bc   : > { %v2001_v37 = vpack.c.bf16 %v1647_v35, %v1644_v32  ;;  %v1649_v38 = vpop.f32.mrb[91].mxu0  ;;  %v4664_v32 = vld [vmem:[%s6266_s2 + $0xe0] ss:$16 sps:$4 sm:$0xff]  }
 0x1bd   : > { %3487 = vmatpush1.bf16.msra.mxu1 %v4664_v32  ;;  %v4635_v32 = vld [vmem:[%s5183_s13 + $0x3e4] ss:$8 sps:$4 sm:$0xff]  }
 0x1be   : > { %1859 = vmatmul.mubr.bf16.gmra.mrb[196].mxu0 %v4598_v34  ;;  %2102 = vxpose.xlu1.c.b16.cont [7/8] (narrow) %v2001_v37, 16  ;;  %v4667_v34 = vld [vmem:[%s6266_s2 + $0x100] ss:$16 sps:$4 sm:$0xff]  }
 0x1bf   : > { %4092 = vmatprep.mubr.msk.bf16.mxu0 %vm1234_vm0, %v4599_v36  ;;  %3488 = vmatprep.subr.bf16.mxu1 %v4665_v33  ;;  %v4619_v37 = vld [vmem:[%s5183_s13 + $0x380] ss:$8 sps:$4 sm:$0xff]   ;;  %v4700_v33 = vld [vmem:[%s6266_s2 + $0x264] ss:$16 sps:$4 sm:$0xff]  }
 0x1c1   : > { %v1652_v39 = vpop.f32.mrb[92].mxu0  ;;  %3489 = vmatpush1.bf16.msra.mxu1 %v4667_v34 }
 0x1c2   : > { %v1654_v40 = vpop.f32.mrb[93].mxu0 }
 0x1c3   : > { %v1655_v42 = vpop.f32.mrb[94].mxu0  ;;  %v4668_v40 = vld [vmem:[%s6266_s2 + $0x124] ss:$16 sps:$4 sm:$0xff]  }
 0x1c4   : > { %v2002_v44 = vpack.c.bf16 %v1655_v42, %v1652_v39  ;;  %v1657_v45 = vpop.f32.mrb[95].mxu0  ;;  %v4620_v39 = vld [vmem:[%s5183_s13 + $0x394] ss:$8 sps:$4 sm:$0xff]   ;;  %3490 = vmatprep.subr.bf16.mxu1 %v4668_v40 }
 0x1c5   : > { %v4673_v45 = vld [vmem:[%s6266_s2 + $0x140] ss:$16 sps:$4 sm:$0xff]  }
 0x1c6   : > { %1867 = vmatmul.mubr.bf16.gmra.mrb[200].mxu0 %v4601_v41  ;;  %2103 = vxpose.xlu1.c.b16.end [8/8] (narrow) %v2002_v44, 16  ;;  %v4671_v44 = vld [vmem:[%s6266_s2 + $0x144] ss:$16 sps:$4 sm:$0xff]  }
 0x1c7   : > { %4093 = vmatprep.mubr.msk.bf16.mxu0 %vm1234_vm0, %v4602_v43  ;;  %v4670_v43 = vld [vmem:[%s6266_s2 + $0x120] ss:$16 sps:$4 sm:$0xff]  }
 0x1c8   : > { %3491 = vmatpush1.bf16.msra.mxu1 %v4670_v43  ;;  %v4638_v43 = vld [vmem:[%s5183_s13 + $0x3f4] ss:$8 sps:$4 sm:$0xff]  }
 0x1c9   : > { %v1660_v46 = vpop.f32.mrb[96].mxu0  ;;  %3492 = vmatprep.subr.bf16.mxu1 %v4671_v44  ;;  %v4706_v44 = vld [vmem:[%s6266_s2 + $0x2a4] ss:$16 sps:$4 sm:$0xff]  }
 0x1ca   : > { %v1662_v47 = vpop.f32.mrb[97].mxu0 }
 0x1cb   : > { %v1663_v49 = vpop.f32.mrb[98].mxu0 }
 0x1cc   : > { %v2003_v51 = vpack.c.bf16 %v1663_v49, %v1660_v46  ;;  %v1665_v52 = vpop.f32.mrb[99].mxu0  ;;  %3493 = vmatpush1.bf16.msra.mxu1 %v4673_v45 }
 0x1ce   : > { %1875 = vmatmul.mubr.bf16.gmra.mrb[204].mxu0 %v4604_v48  ;;  %2112 = vxpose.xlu0.c.b16.start [1/8] (narrow) %v2003_v51, 16  ;;  %v4622_v48 = vld [vmem:[%s5183_s13 + $0x390] ss:$8 sps:$4 sm:$0xff]   ;;  %v4674_v51 = vld [vmem:[%s6266_s2 + $0x164] ss:$16 sps:$4 sm:$0xff]  }
 0x1cf   : > { %4094 = vmatprep.mubr.msk.bf16.mxu0 %vm1234_vm0, %v4605_v50  ;;  %v4623_v50 = vld [vmem:[%s5183_s13 + $0x3a4] ss:$8 sps:$4 sm:$0xff]   ;;  %3494 = vmatprep.subr.bf16.mxu1 %v4674_v51 }
 0x1d0   : > { %3495 = vmatpush1.bf16.msra.mxu1 %v4676_v54  ;;  %v4712_v54 = vld [vmem:[%s6266_s2 + $0x2e4] ss:$16 sps:$4 sm:$0xff]  }
 0x1d1   : > { %v1668_v55 = vpop.f32.mrb[100].mxu0 }
 0x1d2   : > { %v1670_v56 = vpop.f32.mrb[101].mxu0 }
 0x1d3   : > { %v1671_v58 = vpop.f32.mrb[102].mxu0  ;;  %v4679_v56 = vld [vmem:[%s6266_s2 + $0x180] ss:$16 sps:$4 sm:$0xff]  }
 0x1d4   : > { %v2004_v61 = vpack.c.bf16 %v1671_v58, %v1668_v55  ;;  %v1673_v62 = vpop.f32.mrb[103].mxu0  ;;  %v4677_v55 = vld [vmem:[%s6266_s2 + $0x184] ss:$16 sps:$4 sm:$0xff]  }
 0x1d5   : > { %3496 = vmatprep.subr.bf16.mxu1 %v4677_v55  ;;  %v4680_v62 = vld [vmem:[%s6266_s2 + $0x1a4] ss:$16 sps:$4 sm:$0xff]  }
 0x1d6   : > { %1883 = vmatmul.mubr.bf16.gmra.mrb[208].mxu0 %v4607_v57  ;;  %2113 = vxpose.xlu0.c.b16.cont [2/8] (narrow) %v2004_v61, 16  ;;  %v4626_v61 = vld [vmem:[%s5183_s13 + $0x3b4] ss:$8 sps:$4 sm:$0xff]  }
 0x1d7   : > { %4095 = vmatprep.mubr.msk.bf16.mxu0 %vm1234_vm0, %v4608_v59  ;;  %v4625_v59 = vld [vmem:[%s5183_s13 + $0x3a0] ss:$8 sps:$4 sm:$0xff]   ;;  %3497 = vmatpush1.bf16.msra.mxu1 %v4679_v56 }
 0x1d8   : > { %3498 = vmatprep.subr.bf16.mxu1 %v4680_v62 }
 0x1d9   : > { %v1676_v2 = vpop.f32.mrb[104].mxu0 }
 0x1da   : > { %v1678_v3 = vpop.f32.mrb[105].mxu0 }
 0x1db   : > { %v1679_v5 = vpop.f32.mrb[106].mxu0  ;;  %3499 = vmatpush1.bf16.msra.mxu1 %v4682_v1  ;;  %v4685_v3 = vld [vmem:[%s6266_s2 + $0x1c0] ss:$16 sps:$4 sm:$0xff]  }
 0x1dc   : > { %v2005_v8 = vpack.c.bf16 %v1679_v5, %v1676_v2  ;;  %v1681_v9 = vpop.f32.mrb[107].mxu0  ;;  %v4683_v2 = vld [vmem:[%s6266_s2 + $0x1c4] ss:$16 sps:$4 sm:$0xff]  }
 0x1dd   : > { %3500 = vmatprep.subr.bf16.mxu1 %v4683_v2  ;;  %v4686_v9 = vld [vmem:[%s6266_s2 + $0x1e4] ss:$16 sps:$4 sm:$0xff]   ;;  %v4716_v2 = vld [vmem:[%s6266_s2 + $0x320] ss:$16 sps:$4 sm:$0xff]  }
 0x1de   : > { %1891 = vmatmul.mubr.bf16.gmra.mrb[212].mxu0 %v4610_v4  ;;  %2114 = vxpose.xlu0.c.b16.cont [3/8] (narrow) %v2005_v8, 16  ;;  %v4629_v8 = vld [vmem:[%s5183_s13 + $0x3c4] ss:$8 sps:$4 sm:$0xff]  }
 0x1df   : > { %4096 = vmatprep.mubr.msk.bf16.mxu0 %vm1234_vm0, %v4611_v6  ;;  %v4628_v6 = vld [vmem:[%s5183_s13 + $0x3b0] ss:$8 sps:$4 sm:$0xff]   ;;  %3501 = vmatpush1.bf16.msra.mxu1 %v4685_v3  ;;  %v4721_v3 = vld [vmem:[%s6266_s2 + $0x344] ss:$16 sps:$4 sm:$0xff]  }
 0x1e0   : > { %3502 = vmatprep.subr.bf16.mxu1 %v4686_v9 }
 0x1e1   : > { %v1684_v13 = vpop.f32.mrb[108].mxu0 }
 0x1e2   : > { %v1686_v14 = vpop.f32.mrb[109].mxu0 }
 0x1e3   : > { %v1687_v16 = vpop.f32.mrb[110].mxu0  ;;  %v4691_v14 = vld [vmem:[%s6266_s2 + $0x204] ss:$16 sps:$4 sm:$0xff]   ;;  %3503 = vmatpush1.bf16.msra.mxu1 %v4688_v12 }
 0x1e4   : > { %v2006_v19 = vpack.c.bf16 %v1687_v16, %v1684_v13  ;;  %v1689_v20 = vpop.f32.mrb[111].mxu0  ;;  %v5480_v13 = vpop.trf.xlu0  ;;  %3513 = vmatprep.subr.bf16.mxu1 %v4691_v14  ;;  %v4727_v12 = vld [vmem:[%s6266_s2 + $0x384] ss:$16 sps:$4 sm:$0xff]   ;;  %v4725_v14 = vld [vmem:[%s6266_s2 + $0x380] ss:$16 sps:$4 sm:$0xff]  }
 0x1e5   : > { %v5489_v16 = vpop.trf.xlu1  ;;  %3504 = vmatprep.mubr.bf16.mxu1 %v5480_v13 }
 0x1e6   : > { %1899 = vmatmul.mubr.bf16.gmra.mrb[216].mxu0 %v4613_v15  ;;  %2115 = vxpose.xlu0.c.b16.cont [4/8] (narrow) %v2006_v19, 16  ;;  %v4689_v15 = vld [vmem:[%s6266_s2 + $0x200] ss:$16 sps:$4 sm:$0xff]  }
 0x1e7   : > { %4097 = vmatprep.mubr.msk.bf16.mxu0 %vm1234_vm0, %v4614_v17  ;;  %v4631_v19 = vld [vmem:[%s5183_s13 + $0x3c0] ss:$8 sps:$4 sm:$0xff]   ;;  %3505 = vmatmul.mubr.bf16.vlgmr.msra.gmra.mrb[0].mxu1 %v5489_v16 }
 0x1e8   : > { %3514 = vmatpush1.bf16.msra.mxu1 %v4689_v15 }
 0x1e9   : > { %v1692_v24 = vpop.f32.mrb[112].mxu0  ;;  %3515 = vmatprep.subr.bf16.mxu1 %v4694_v22  ;;  %v4728_v22 = vld [vmem:[%s6266_s2 + $0x3a0] ss:$16 sps:$4 sm:$0xff]  }
 0x1ea   : > { %v1694_v25 = vpop.f32.mrb[113].mxu0 }
 0x1eb   : > { %v1695_v27 = vpop.f32.mrb[114].mxu0  ;;  %v4692_v25 = vld [vmem:[%s6266_s2 + $0x220] ss:$16 sps:$4 sm:$0xff]  }
 0x1ec   : > { %v2007_v30 = vpack.c.bf16 %v1695_v27, %v1692_v24  ;;  %v1697_v31 = vpop.f32.mrb[115].mxu0  ;;  %3516 = vmatpush1.bf16.msra.mxu1 %v4692_v25  ;;  %v4695_v27 = vld [vmem:[%s6266_s2 + $0x240] ss:$16 sps:$4 sm:$0xff]  }
 0x1ee   : > { %1907 = vmatmul.mubr.bf16.gmra.mrb[220].mxu0 %v4616_v26  ;;  %2116 = vxpose.xlu0.c.b16.cont [5/8] (narrow) %v2007_v30, 16  ;;  %v4697_v26 = vld [vmem:[%s6266_s2 + $0x244] ss:$16 sps:$4 sm:$0xff]   ;;  %v4634_v30 = vld [vmem:[%s5183_s13 + $0x3d0] ss:$8 sps:$4 sm:$0xff]  }
 0x1ef   : > { %4098 = vmatprep.mubr.msk.bf16.mxu0 %vm1234_vm0, %v4617_v28  ;;  %3517 = vmatprep.subr.bf16.mxu1 %v4697_v26 }
 0x1f0   : > { %3518 = vmatpush1.bf16.msra.mxu1 %v4695_v27 }
 0x1f1   : > { %v1700_v35 = vpop.f32.mrb[116].mxu0  ;;  %3519 = vmatprep.subr.bf16.mxu1 %v4700_v33  ;;  %v4737_v33 = vld [vmem:[%s6266_s2 + $0x400] ss:$16 sps:$4 sm:$0xff]  }
 0x1f2   : > { %v1702_v36 = vpop.f32.mrb[117].mxu0 }
 0x1f3   : > { %v1703_v38 = vpop.f32.mrb[118].mxu0  ;;  %v4698_v36 = vld [vmem:[%s6266_s2 + $0x260] ss:$16 sps:$4 sm:$0xff]  }
 0x1f4   : > { %v2008_v41 = vpack.c.bf16 %v1703_v38, %v1700_v35  ;;  %v1705_v42 = vpop.f32.mrb[119].mxu0  ;;  %3520 = vmatpush1.bf16.msra.mxu1 %v4698_v36  ;;  %v4701_v38 = vld [vmem:[%s6266_s2 + $0x280] ss:$16 sps:$4 sm:$0xff]  }
 0x1f6   : > { %1915 = vmatmul.mubr.bf16.gmra.mrb[224].mxu0 %v4619_v37  ;;  %2117 = vxpose.xlu0.c.b16.cont [6/8] (narrow) %v2008_v41, 16  ;;  %v4703_v37 = vld [vmem:[%s6266_s2 + $0x284] ss:$16 sps:$4 sm:$0xff]   ;;  %v4637_v41 = vld [vmem:[%s5183_s13 + $0x3e0] ss:$8 sps:$4 sm:$0xff]  }
 0x1f7   : > { %4099 = vmatprep.mubr.msk.bf16.mxu0 %vm1234_vm0, %v4620_v39  ;;  %3521 = vmatprep.subr.bf16.mxu1 %v4703_v37 }
 0x1f8   : > { %3522 = vmatpush1.bf16.msra.mxu1 %v4701_v38 }
 0x1f9   : > { %v1708_v46 = vpop.f32.mrb[120].mxu0  ;;  %3523 = vmatprep.subr.bf16.mxu1 %v4706_v44  ;;  %v4743_v44 = vld [vmem:[%s6266_s2 + $0x440] ss:$16 sps:$4 sm:$0xff]  }
 0x1fa   : > { %v1710_v47 = vpop.f32.mrb[121].mxu0 }
 0x1fb   : > { %v1711_v49 = vpop.f32.mrb[122].mxu0  ;;  %v4704_v47 = vld [vmem:[%s6266_s2 + $0x2a0] ss:$16 sps:$4 sm:$0xff]  }
 0x1fc   : > { %v2009_v52 = vpack.c.bf16 %v1711_v49, %v1708_v46  ;;  %v1713_v53 = vpop.f32.mrb[123].mxu0  ;;  %3524 = vmatpush1.bf16.msra.mxu1 %v4704_v47  ;;  %v4707_v49 = vld [vmem:[%s6266_s2 + $0x2c0] ss:$16 sps:$4 sm:$0xff]  }
 0x1fe   : > { %1923 = vmatmul.mubr.bf16.gmra.mrb[228].mxu0 %v4622_v48  ;;  %2118 = vxpose.xlu0.c.b16.cont [7/8] (narrow) %v2009_v52, 16  ;;  %v4709_v48 = vld [vmem:[%s6266_s2 + $0x2c4] ss:$16 sps:$4 sm:$0xff]   ;;  %v4640_v52 = vld [vmem:[%s5183_s13 + $0x3f0] ss:$8 sps:$4 sm:$0xff]   ;;  %s5025_s13 = scalar_lea.vmem %s6224_s6, 128 }
 0x1ff   : > { %4100 = vmatprep.mubr.msk.bf16.mxu0 %vm1234_vm0, %v4623_v50  ;;  %3525 = vmatprep.subr.bf16.mxu1 %v4709_v48  ;;  %v4748_v48 = vld [vmem:[%s6266_s2 + $0x464] ss:$16 sps:$4 sm:$0xff]   ;;  %p5026_p11 = scmp.ne.s32.totalorder %s6224_s6, %s5025_s13  ;;  %p5033_p1 = scmp.lt.s32.totalorder %s5031_s12, %s5025_s13 }
 0x200   : > { %3526 = vmatpush1.bf16.msra.mxu1 %v4707_v49 }
 0x201   : > { %v1716_v57 = vpop.f32.mrb[124].mxu0  ;;  %3527 = vmatprep.subr.bf16.mxu1 %v4712_v54  ;;  %p5027_p12 = pnand %p5026_p11, %p5156_p5  ;;  %p5034_p2 = por %p5033_p1, %p5032_p0 }
 0x202   : > { %v1718_v58 = vpop.f32.mrb[125].mxu0 }
 0x203   : > { %v1719_v60 = vpop.f32.mrb[126].mxu0  ;;  %v4715_v58 = vld [vmem:[%s6266_s2 + $0x304] ss:$16 sps:$4 sm:$0xff]   ;;  %p5028_p13 = pneg %p5027_p12 }
 0x204   : > { %v2010_v63 = vpack.c.bf16 %v1719_v60, %v1716_v57  ;;  %v1721_v0 = vpop.f32.mrb[127].mxu0  ;;  %v4710_v57 = vld [vmem:[%s6266_s2 + $0x2e0] ss:$16 sps:$4 sm:$0xff]  }
 0x205   : > { %3528 = vmatpush1.bf16.msra.mxu1 %v4710_v57  ;;  %v4754_v57 = vld [vmem:[%s6266_s2 + $0x4a4] ss:$16 sps:$4 sm:$0xff]   ;;  %p5035_p3 = pnand %p5034_p2, %p5028_p13 }
 0x206   : > { %1931 = vmatmul.mubr.bf16.gmra.mrb[232].mxu0 %v4625_v59  ;;  %2119 = vxpose.xlu0.c.b16.end [8/8] (narrow) %v2010_v63, 16  ;;  %v4713_v59 = vld [vmem:[%s6266_s2 + $0x300] ss:$16 sps:$4 sm:$0xff]   ;;  %v4718_v63 = vld [vmem:[%s6266_s2 + $0x324] ss:$16 sps:$4 sm:$0xff]  }
 0x207   : > { %4101 = vmatprep.mubr.msk.bf16.mxu0 %vm1234_vm0, %v4626_v61  ;;  %3529 = vmatprep.subr.bf16.mxu1 %v4715_v58 }
 0x209   : > { %v1724_v4 = vpop.f32.mrb[128].mxu0  ;;  %3530 = vmatpush1.bf16.msra.mxu1 %v4713_v59 }
 0x20a   : > { %v1726_v5 = vpop.f32.mrb[129].mxu0  ;;  %3531 = vmatprep.subr.bf16.mxu1 %v4718_v63 }
 0x20b   : > { %v1727_v7 = vpop.f32.mrb[130].mxu0 }
 0x20c   : > { %v2011_v10 = vpack.c.bf16 %v1727_v7, %v1724_v4  ;;  %v1729_v11 = vpop.f32.mrb[131].mxu0  ;;  %v4719_v4 = vld [vmem:[%s6266_s2 + $0x340] ss:$16 sps:$4 sm:$0xff]  }
 0x20d   : > { %3532 = vmatpush1.bf16.msra.mxu1 %v4716_v2  ;;  %v4722_v11 = vld [vmem:[%s6266_s2 + $0x360] ss:$16 sps:$4 sm:$0xff]   ;;  %v4760_v2 = vld [vmem:[%s6266_s2 + $0x4e4] ss:$16 sps:$4 sm:$0xff]  }
 0x20e   : > { %1939 = vmatmul.mubr.bf16.gmra.mrb[236].mxu0 %v4628_v6  ;;  %2128 = vxpose.xlu1.c.b16.start [1/8] (narrow) %v2011_v10, 16 }
 0x20f   : > { %4102 = vmatprep.mubr.msk.bf16.mxu0 %vm1234_vm0, %v4629_v8  ;;  %3533 = vmatprep.subr.bf16.mxu1 %v4721_v3  ;;  %v4724_v8 = vld [vmem:[%s6266_s2 + $0x364] ss:$16 sps:$4 sm:$0xff]  }
 0x211   : > { %v1732_v17 = vpop.f32.mrb[132].mxu0  ;;  %3534 = vmatpush1.bf16.msra.mxu1 %v4719_v4 }
 0x212   : > { %v1734_v18 = vpop.f32.mrb[133].mxu0  ;;  %3535 = vmatprep.subr.bf16.mxu1 %v4724_v8 }
 0x213   : > { %v1735_v20 = vpop.f32.mrb[134].mxu0 }
 0x214   : > { %v2012_v23 = vpack.c.bf16 %v1735_v20, %v1732_v17  ;;  %v1737_v24 = vpop.f32.mrb[135].mxu0 }
 0x215   : > { %3536 = vmatpush1.bf16.msra.mxu1 %v4722_v11  ;;  %v4731_v24 = vld [vmem:[%s6266_s2 + $0x3c0] ss:$16 sps:$4 sm:$0xff]   ;;  %v4766_v11 = vld [vmem:[%s6266_s2 + $0x524] ss:$16 sps:$4 sm:$0xff]  }
 0x216   : > { %1947 = vmatmul.mubr.bf16.gmra.mrb[240].mxu0 %v4631_v19  ;;  %2129 = vxpose.xlu1.c.b16.cont [2/8] (narrow) %v2012_v23, 16  ;;  %v4730_v19 = vld [vmem:[%s6266_s2 + $0x3a4] ss:$16 sps:$4 sm:$0xff]  }
 0x217   : > { %4103 = vmatprep.mubr.msk.bf16.mxu0 %vm1234_vm0, %v4632_v21  ;;  %3537 = vmatprep.subr.bf16.mxu1 %v4727_v12  ;;  %v4733_v23 = vld [vmem:[%s6266_s2 + $0x3c4] ss:$16 sps:$4 sm:$0xff]  }
 0x219   : > { %v1740_v28 = vpop.f32.mrb[136].mxu0  ;;  %3538 = vmatpush1.bf16.msra.mxu1 %v4725_v14 }
 0x21a   : > { %v1742_v29 = vpop.f32.mrb[137].mxu0  ;;  %3539 = vmatprep.subr.bf16.mxu1 %v4730_v19 }
 0x21b   : > { %v1743_v31 = vpop.f32.mrb[138].mxu0 }
 0x21c   : > { %v2013_v34 = vpack.c.bf16 %v1743_v31, %v1740_v28  ;;  %v1745_v35 = vpop.f32.mrb[139].mxu0  ;;  %v4736_v28 = vld [vmem:[%s6266_s2 + $0x3e4] ss:$16 sps:$4 sm:$0xff]   ;;  %v4734_v31 = vld [vmem:[%s6266_s2 + $0x3e0] ss:$16 sps:$4 sm:$0xff]  }
 0x21d   : > { %3540 = vmatpush1.bf16.msra.mxu1 %v4728_v22  ;;  %v4772_v22 = vld [vmem:[%s6266_s2 + $0x564] ss:$16 sps:$4 sm:$0xff]  }
 0x21e   : > { %1955 = vmatmul.mubr.bf16.gmra.mrb[244].mxu0 %v4634_v30  ;;  %2130 = vxpose.xlu1.c.b16.cont [3/8] (narrow) %v2013_v34, 16  ;;  %v5599_v34 = vpop.trf.xlu1 }
 0x21f   : > { %4104 = vmatprep.mubr.msk.bf16.mxu0 %vm1234_vm0, %v4635_v32  ;;  %3541 = vmatprep.subr.bf16.mxu1 %v4733_v23  ;;  %v4739_v32 = vld [vmem:[%s6266_s2 + $0x404] ss:$16 sps:$4 sm:$0xff]  }
 0x221   : > { %v1748_v39 = vpop.f32.mrb[140].mxu0  ;;  %3542 = vmatpush1.bf16.msra.mxu1 %v4731_v24 }
 0x222   : > { %v1750_v40 = vpop.f32.mrb[141].mxu0  ;;  %3543 = vmatprep.subr.bf16.mxu1 %v4736_v28 }
 0x223   : > { %v1751_v42 = vpop.f32.mrb[142].mxu0 }
 0x224   : > { %v2014_v45 = vpack.c.bf16 %v1751_v42, %v1748_v39  ;;  %v1753_v46 = vpop.f32.mrb[143].mxu0  ;;  %v4742_v39 = vld [vmem:[%s6266_s2 + $0x424] ss:$16 sps:$4 sm:$0xff]   ;;  %v4740_v42 = vld [vmem:[%s6266_s2 + $0x420] ss:$16 sps:$4 sm:$0xff]  }
 0x225   : > { %3544 = vmatpush1.bf16.msra.mxu1 %v4734_v31  ;;  %v4778_v31 = vld [vmem:[%s6266_s2 + $0x5a4] ss:$16 sps:$4 sm:$0xff]  }
 0x226   : > { %1963 = vmatmul.mubr.bf16.gmra.mrb[248].mxu0 %v4637_v41  ;;  %2131 = vxpose.xlu1.c.b16.cont [4/8] (narrow) %v2014_v45, 16 }
 0x227   : > { %4105 = vmatprep.mubr.msk.bf16.mxu0 %vm1234_vm0, %v4638_v43  ;;  %3554 = vmatprep.subr.bf16.mxu1 %v4739_v32  ;;  %v4745_v43 = vld [vmem:[%s6266_s2 + $0x444] ss:$16 sps:$4 sm:$0xff]  }
 0x229   : > { %v1756_v50 = vpop.f32.mrb[144].mxu0 }
 0x22a   : > { %v1758_v51 = vpop.f32.mrb[145].mxu0 }
 0x22b   : > { %v1759_v53 = vpop.f32.mrb[146].mxu0  ;;  %v4746_v51 = vld [vmem:[%s6266_s2 + $0x460] ss:$16 sps:$4 sm:$0xff]  }
 0x22c   : > { %v2015_v55 = vpack.c.bf16 %v1759_v53, %v1756_v50  ;;  %v1761_v56 = vpop.f32.mrb[147].mxu0  ;;  %v4749_v53 = vld [vmem:[%s6266_s2 + $0x480] ss:$16 sps:$4 sm:$0xff]  }
 0x22e   : > { %1971 = vmatmul.mubr.bf16.gmra.mrb[252].mxu0 %v4640_v52  ;;  %2132 = vxpose.xlu1.c.b16.cont [5/8] (narrow) %v2015_v55, 16  ;;  %v4751_v52 = vld [vmem:[%s6266_s2 + $0x484] ss:$16 sps:$4 sm:$0xff]  }
 0x231   : > { %v1764_v60 = vpop.f32.mrb[148].mxu0 }
 0x232   : > { %v1766_v61 = vpop.f32.mrb[149].mxu0 }
 0x233   : > { %v1767_v62 = vpop.f32.mrb[150].mxu0  ;;  %v4757_v61 = vld [vmem:[%s6266_s2 + $0x4c4] ss:$16 sps:$4 sm:$0xff]  }
 0x234   : > { %v2016_v0 = vpack.c.bf16 %v1767_v62, %v1764_v60  ;;  %v1769_v1 = vpop.f32.mrb[151].mxu0  ;;  %v4752_v60 = vld [vmem:[%s6266_s2 + $0x4a0] ss:$16 sps:$4 sm:$0xff]  }
 0x235   : > { %v4755_v62 = vld [vmem:[%s6266_s2 + $0x4c0] ss:$16 sps:$4 sm:$0xff]  }
 0x236   : > { %2133 = vxpose.xlu1.c.b16.cont [6/8] (narrow) %v2016_v0, 16 }
 0x239   : > { %v1772_v5 = vpop.f32.mrb[152].mxu0 }
 0x23a   : > { %v1774_v6 = vpop.f32.mrb[153].mxu0 }
 0x23b   : > { %v1775_v7 = vpop.f32.mrb[154].mxu0  ;;  %v4763_v6 = vld [vmem:[%s6266_s2 + $0x504] ss:$16 sps:$4 sm:$0xff]  }
 0x23c   : > { %v2017_v9 = vpack.c.bf16 %v1775_v7, %v1772_v5  ;;  %v1777_v10 = vpop.f32.mrb[155].mxu0  ;;  %v4758_v5 = vld [vmem:[%s6266_s2 + $0x4e0] ss:$16 sps:$4 sm:$0xff]  }
 0x23d   : > { %v4761_v7 = vld [vmem:[%s6266_s2 + $0x500] ss:$16 sps:$4 sm:$0xff]  }
 0x23e   : > { %2134 = vxpose.xlu1.c.b16.cont [7/8] (narrow) %v2017_v9, 16 }
 0x241   : > { %v1780_v15 = vpop.f32.mrb[156].mxu0 }
 0x242   : > { %v1782_v17 = vpop.f32.mrb[157].mxu0 }
 0x243   : > { %v1783_v18 = vpop.f32.mrb[158].mxu0  ;;  %v4769_v17 = vld [vmem:[%s6266_s2 + $0x544] ss:$16 sps:$4 sm:$0xff]  }
 0x244   : > { %v2018_v20 = vpack.c.bf16 %v1783_v18, %v1780_v15  ;;  %v1785_v21 = vpop.f32.mrb[159].mxu0  ;;  %v4764_v15 = vld [vmem:[%s6266_s2 + $0x520] ss:$16 sps:$4 sm:$0xff]  }
 0x245   : > { %v4767_v18 = vld [vmem:[%s6266_s2 + $0x540] ss:$16 sps:$4 sm:$0xff]  }
 0x246   : > { %2135 = vxpose.xlu1.c.b16.end [8/8] (narrow) %v2018_v20, 16 }
 0x249   : > { %v1788_v25 = vpop.f32.mrb[160].mxu0 }
 0x24a   : > { %v1790_v26 = vpop.f32.mrb[161].mxu0 }
 0x24b   : > { %v1791_v27 = vpop.f32.mrb[162].mxu0  ;;  %v4775_v26 = vld [vmem:[%s6266_s2 + $0x584] ss:$16 sps:$4 sm:$0xff]  }
 0x24c   : > { %v2019_v29 = vpack.c.bf16 %v1791_v27, %v1788_v25  ;;  %v1793_v30 = vpop.f32.mrb[163].mxu0  ;;  %v4770_v25 = vld [vmem:[%s6266_s2 + $0x560] ss:$16 sps:$4 sm:$0xff]  }
 0x24d   : > { %v4773_v27 = vld [vmem:[%s6266_s2 + $0x580] ss:$16 sps:$4 sm:$0xff]  }
 0x24e   : > { %2144 = vxpose.xlu0.c.b16.start [1/8] (narrow) %v2019_v29, 16 }
 0x250   : > { %v5601_v35 = vpop.trf.xlu0 }
 0x251   : > { %v1796_v36 = vpop.f32.mrb[164].mxu0  ;;  %3545 = vmatprep.mubr.bf16.mxu1 %v5601_v35 }
 0x252   : > { %v1798_v37 = vpop.f32.mrb[165].mxu0  ;;  %3546 = vmatmul.mubr.bf16.vlgmr.msra.gmra.mrb[0].mxu1 %v5599_v34 }
 0x253   : > { %v1799_v38 = vpop.f32.mrb[166].mxu0  ;;  %3555 = vmatpush1.bf16.msra.mxu1 %v4737_v33  ;;  %v4781_v37 = vld [vmem:[%s6266_s2 + $0x5c4] ss:$16 sps:$4 sm:$0xff]  }
 0x254   : > { %v2020_v40 = vpack.c.bf16 %v1799_v38, %v1796_v36  ;;  %v1801_v41 = vpop.f32.mrb[167].mxu0  ;;  %3556 = vmatprep.subr.bf16.mxu1 %v4742_v39  ;;  %v4776_v36 = vld [vmem:[%s6266_s2 + $0x5a0] ss:$16 sps:$4 sm:$0xff]   ;;  %v4784_v39 = vld [vmem:[%s6266_s2 + $0x5e4] ss:$16 sps:$4 sm:$0xff]  }
 0x255   : > { %v4779_v38 = vld [vmem:[%s6266_s2 + $0x5c0] ss:$16 sps:$4 sm:$0xff]  }
 0x256   : > { %2145 = vxpose.xlu0.c.b16.cont [2/8] (narrow) %v2020_v40, 16 }
 0x257   : > { %3557 = vmatpush1.bf16.msra.mxu1 %v4740_v42 }
 0x258   : > { %3558 = vmatprep.subr.bf16.mxu1 %v4745_v43  ;;  %v4782_v43 = vld [vmem:[%s6266_s2 + $0x5e0] ss:$16 sps:$4 sm:$0xff]  }
 0x259   : > { %v1804_v45 = vpop.f32.mrb[168].mxu0 }
 0x25a   : > { %v1806_v46 = vpop.f32.mrb[169].mxu0 }
 0x25b   : > { %v1807_v47 = vpop.f32.mrb[170].mxu0  ;;  %3559 = vmatpush1.bf16.msra.mxu1 %v4743_v44  ;;  %v4787_v46 = vld [vmem:[%s6266_s2 + $0x604] ss:$16 sps:$4 sm:$0xff]  }
 0x25c   : > { %v2021_v49 = vpack.c.bf16 %v1807_v47, %v1804_v45  ;;  %v1809_v50 = vpop.f32.mrb[171].mxu0  ;;  %3560 = vmatprep.subr.bf16.mxu1 %v4748_v48 }
 0x25e   : > { %2146 = vxpose.xlu0.c.b16.cont [3/8] (narrow) %v2021_v49, 16 }
 0x25f   : > { %3561 = vmatpush1.bf16.msra.mxu1 %v4746_v51 }
 0x260   : > { %3562 = vmatprep.subr.bf16.mxu1 %v4751_v52 }
 0x261   : > { %v1812_v54 = vpop.f32.mrb[172].mxu0 }
 0x262   : > { %v1814_v55 = vpop.f32.mrb[173].mxu0 }
 0x263   : > { %v1815_v56 = vpop.f32.mrb[174].mxu0  ;;  %3563 = vmatpush1.bf16.msra.mxu1 %v4749_v53 }
 0x264   : > { %v2022_v58 = vpack.c.bf16 %v1815_v56, %v1812_v54  ;;  %v1817_v59 = vpop.f32.mrb[175].mxu0  ;;  %3564 = vmatprep.subr.bf16.mxu1 %v4754_v57 }
 0x266   : > { %2147 = vxpose.xlu0.c.b16.cont [4/8] (narrow) %v2022_v58, 16 }
 0x267   : > { %3565 = vmatpush1.bf16.msra.mxu1 %v4752_v60 }
 0x268   : > { %3566 = vmatprep.subr.bf16.mxu1 %v4757_v61 }
 0x269   : > { %v1820_v63 = vpop.f32.mrb[176].mxu0 }
 0x26a   : > { %v1822_v0 = vpop.f32.mrb[177].mxu0 }
 0x26b   : > { %v1823_v1 = vpop.f32.mrb[178].mxu0  ;;  %3567 = vmatpush1.bf16.msra.mxu1 %v4755_v62 }
 0x26c   : > { %v2023_v3 = vpack.c.bf16 %v1823_v1, %v1820_v63  ;;  %v1825_v4 = vpop.f32.mrb[179].mxu0  ;;  %3568 = vmatprep.subr.bf16.mxu1 %v4760_v2 }
 0x26e   : > { %2148 = vxpose.xlu0.c.b16.cont [5/8] (narrow) %v2023_v3, 16 }
 0x26f   : > { %3569 = vmatpush1.bf16.msra.mxu1 %v4758_v5 }
 0x270   : > { %3570 = vmatprep.subr.bf16.mxu1 %v4763_v6 }
 0x271   : > { %v1828_v8 = vpop.f32.mrb[180].mxu0 }
 0x272   : > { %v1830_v9 = vpop.f32.mrb[181].mxu0 }
 0x273   : > { %v1831_v10 = vpop.f32.mrb[182].mxu0  ;;  %3571 = vmatpush1.bf16.msra.mxu1 %v4761_v7 }
 0x274   : > { %v2024_v12 = vpack.c.bf16 %v1831_v10, %v1828_v8  ;;  %v1833_v14 = vpop.f32.mrb[183].mxu0  ;;  %3572 = vmatprep.subr.bf16.mxu1 %v4766_v11 }
 0x276   : > { %2149 = vxpose.xlu0.c.b16.cont [6/8] (narrow) %v2024_v12, 16 }
 0x277   : > { %3573 = vmatpush1.bf16.msra.mxu1 %v4764_v15 }
 0x278   : > { %3574 = vmatprep.subr.bf16.mxu1 %v4769_v17 }
 0x279   : > { %v1836_v19 = vpop.f32.mrb[184].mxu0 }
 0x27a   : > { %v1838_v20 = vpop.f32.mrb[185].mxu0 }
 0x27b   : > { %v1839_v21 = vpop.f32.mrb[186].mxu0  ;;  %3575 = vmatpush1.bf16.msra.mxu1 %v4767_v18 }
 0x27c   : > { %v2025_v23 = vpack.c.bf16 %v1839_v21, %v1836_v19  ;;  %v1841_v24 = vpop.f32.mrb[187].mxu0  ;;  %3576 = vmatprep.subr.bf16.mxu1 %v4772_v22 }
 0x27e   : > { %2150 = vxpose.xlu0.c.b16.cont [7/8] (narrow) %v2025_v23, 16 }
 0x27f   : > { %3577 = vmatpush1.bf16.msra.mxu1 %v4770_v25  ;;  %v4785_v25 = vld [vmem:[%s6266_s2 + $0x600] ss:$16 sps:$4 sm:$0xff]  }
 0x280   : > { %3578 = vmatprep.subr.bf16.mxu1 %v4775_v26 }
 0x281   : > { %v1844_v28 = vpop.f32.mrb[188].mxu0 }
 0x282   : > { %v1846_v29 = vpop.f32.mrb[189].mxu0 }
 0x283   : > { %v1847_v30 = vpop.f32.mrb[190].mxu0  ;;  %3579 = vmatpush1.bf16.msra.mxu1 %v4773_v27 }
 0x284   : > { %v2026_v32 = vpack.c.bf16 %v1847_v30, %v1844_v28  ;;  %v1849_v33 = vpop.f32.mrb[191].mxu0  ;;  %3580 = vmatprep.subr.bf16.mxu1 %v4778_v31  ;;  %v4790_v28 = vld [vmem:[%s6266_s2 + $0x624] ss:$16 sps:$4 sm:$0xff]  }
 0x286   : > { %2151 = vxpose.xlu0.c.b16.end [8/8] (narrow) %v2026_v32, 16  ;;  %v4788_v32 = vld [vmem:[%s6266_s2 + $0x620] ss:$16 sps:$4 sm:$0xff]  }
 0x287   : > { %3581 = vmatpush1.bf16.msra.mxu1 %v4776_v36 }
 0x288   : > { %3582 = vmatprep.subr.bf16.mxu1 %v4781_v37  ;;  %v4793_v37 = vld [vmem:[%s6266_s2 + $0x644] ss:$16 sps:$4 sm:$0xff]  }
 0x289   : > { %v1852_v40 = vpop.f32.mrb[192].mxu0 }
 0x28a   : > { %v1854_v41 = vpop.f32.mrb[193].mxu0 }
 0x28b   : > { %v1855_v42 = vpop.f32.mrb[194].mxu0  ;;  %3583 = vmatpush1.bf16.msra.mxu1 %v4779_v38  ;;  %v4791_v38 = vld [vmem:[%s6266_s2 + $0x640] ss:$16 sps:$4 sm:$0xff]  }
 0x28c   : > { %v2027_v44 = vpack.c.bf16 %v1855_v42, %v1852_v40  ;;  %v1857_v45 = vpop.f32.mrb[195].mxu0  ;;  %3584 = vmatprep.subr.bf16.mxu1 %v4784_v39  ;;  %v4796_v39 = vld [vmem:[%s6266_s2 + $0x664] ss:$16 sps:$4 sm:$0xff]  }
 0x28e   : > { %2160 = vxpose.xlu1.c.b16.start [1/8] (narrow) %v2027_v44, 16 }
 0x28f   : > { %3585 = vmatpush1.bf16.msra.mxu1 %v4782_v43  ;;  %v4794_v43 = vld [vmem:[%s6266_s2 + $0x660] ss:$16 sps:$4 sm:$0xff]  }
 0x290   : > { %3595 = vmatprep.subr.bf16.mxu1 %v4787_v46  ;;  %v5701_v26 = vpop.trf.xlu1  ;;  %v4799_v46 = vld [vmem:[%s6266_s2 + $0x684] ss:$16 sps:$4 sm:$0xff]  }
 0x291   : > { %v1860_v47 = vpop.f32.mrb[196].mxu0 }
 0x292   : > { %v1862_v48 = vpop.f32.mrb[197].mxu0 }
 0x293   : > { %v1863_v49 = vpop.f32.mrb[198].mxu0  ;;  %v4802_v48 = vld [vmem:[%s6266_s2 + $0x6a4] ss:$16 sps:$4 sm:$0xff]  }
 0x294   : > { %v2028_v50 = vpack.c.bf16 %v1863_v49, %v1860_v47  ;;  %v1865_v51 = vpop.f32.mrb[199].mxu0  ;;  %v4797_v47 = vld [vmem:[%s6266_s2 + $0x680] ss:$16 sps:$4 sm:$0xff]  }
 0x296   : > { %2161 = vxpose.xlu1.c.b16.cont [2/8] (narrow) %v2028_v50, 16 }
 0x299   : > { %v1868_v52 = vpop.f32.mrb[200].mxu0 }
 0x29a   : > { %v1870_v53 = vpop.f32.mrb[201].mxu0 }
 0x29b   : > { %v1871_v54 = vpop.f32.mrb[202].mxu0 }
 0x29c   : > { %v2029_v55 = vpack.c.bf16 %v1871_v54, %v1868_v52  ;;  %v1873_v56 = vpop.f32.mrb[203].mxu0  ;;  %v4800_v52 = vld [vmem:[%s6266_s2 + $0x6a0] ss:$16 sps:$4 sm:$0xff]  }
 0x29d   : > { %v4803_v56 = vld [vmem:[%s6266_s2 + $0x6c0] ss:$16 sps:$4 sm:$0xff]  }
 0x29e   : > { %2162 = vxpose.xlu1.c.b16.cont [3/8] (narrow) %v2029_v55, 16  ;;  %v4805_v55 = vld [vmem:[%s6266_s2 + $0x6c4] ss:$16 sps:$4 sm:$0xff]  }
 0x2a1   : > { %v1876_v57 = vpop.f32.mrb[204].mxu0 }
 0x2a2   : > { %v1878_v58 = vpop.f32.mrb[205].mxu0 }
 0x2a3   : > { %v1879_v59 = vpop.f32.mrb[206].mxu0 }
 0x2a4   : > { %v2030_v60 = vpack.c.bf16 %v1879_v59, %v1876_v57  ;;  %v1881_v61 = vpop.f32.mrb[207].mxu0  ;;  %v4808_v57 = vld [vmem:[%s6266_s2 + $0x6e4] ss:$16 sps:$4 sm:$0xff]  }
 0x2a5   : > { %v4806_v61 = vld [vmem:[%s6266_s2 + $0x6e0] ss:$16 sps:$4 sm:$0xff]  }
 0x2a6   : > { %2163 = vxpose.xlu1.c.b16.cont [4/8] (narrow) %v2030_v60, 16 }
 0x2a9   : > { %v1884_v62 = vpop.f32.mrb[208].mxu0 }
 0x2aa   : > { %v1886_v63 = vpop.f32.mrb[209].mxu0 }
 0x2ab   : > { %v1887_v0 = vpop.f32.mrb[210].mxu0 }
 0x2ac   : > { %v2031_v1 = vpack.c.bf16 %v1887_v0, %v1884_v62  ;;  %v1889_v2 = vpop.f32.mrb[211].mxu0  ;;  %v4811_v0 = vld [vmem:[%s6266_s2 + $0x704] ss:$16 sps:$4 sm:$0xff]  }
 0x2ad   : > { %v4814_v2 = vld [vmem:[%s6266_s2 + $0x724] ss:$16 sps:$4 sm:$0xff]  }
 0x2ae   : > { %2164 = vxpose.xlu1.c.b16.cont [5/8] (narrow) %v2031_v1, 16  ;;  %v4809_v1 = vld [vmem:[%s6266_s2 + $0x700] ss:$16 sps:$4 sm:$0xff]  }
 0x2b1   : > { %v1892_v3 = vpop.f32.mrb[212].mxu0 }
 0x2b2   : > { %v1894_v4 = vpop.f32.mrb[213].mxu0 }
 0x2b3   : > { %v1895_v5 = vpop.f32.mrb[214].mxu0 }
 0x2b4   : > { %v2032_v6 = vpack.c.bf16 %v1895_v5, %v1892_v3  ;;  %v1897_v7 = vpop.f32.mrb[215].mxu0 }
 0x2b6   : > { %2165 = vxpose.xlu1.c.b16.cont [6/8] (narrow) %v2032_v6, 16  ;;  %v4812_v6 = vld [vmem:[%s6266_s2 + $0x720] ss:$16 sps:$4 sm:$0xff]  }
 0x2b9   : > { %v1900_v8 = vpop.f32.mrb[216].mxu0 }
 0x2ba   : > { %v1902_v9 = vpop.f32.mrb[217].mxu0 }
 0x2bb   : > { %v1903_v10 = vpop.f32.mrb[218].mxu0  ;;  %v4817_v9 = vld [vmem:[%s6266_s2 + $0x744] ss:$16 sps:$4 sm:$0xff]  }
 0x2bc   : > { %v2033_v11 = vpack.c.bf16 %v1903_v10, %v1900_v8  ;;  %v1905_v12 = vpop.f32.mrb[219].mxu0  ;;  %v4815_v10 = vld [vmem:[%s6266_s2 + $0x740] ss:$16 sps:$4 sm:$0xff]  }
 0x2be   : > { %2166 = vxpose.xlu1.c.b16.cont [7/8] (narrow) %v2033_v11, 16  ;;  %v4820_v11 = vld [vmem:[%s6266_s2 + $0x764] ss:$16 sps:$4 sm:$0xff]  }
 0x2c1   : > { %v1908_v14 = vpop.f32.mrb[220].mxu0 }
 0x2c2   : > { %v1910_v15 = vpop.f32.mrb[221].mxu0 }
 0x2c3   : > { %v1911_v17 = vpop.f32.mrb[222].mxu0 }
 0x2c4   : > { %v2034_v18 = vpack.c.bf16 %v1911_v17, %v1908_v14  ;;  %v1913_v19 = vpop.f32.mrb[223].mxu0  ;;  %v4818_v17 = vld [vmem:[%s6266_s2 + $0x760] ss:$16 sps:$4 sm:$0xff]  }
 0x2c6   : > { %2167 = vxpose.xlu1.c.b16.end [8/8] (narrow) %v2034_v18, 16 }
 0x2c9   : > { %v1916_v20 = vpop.f32.mrb[224].mxu0 }
 0x2ca   : > { %v1918_v21 = vpop.f32.mrb[225].mxu0 }
 0x2cb   : > { %v1919_v22 = vpop.f32.mrb[226].mxu0  ;;  %v4821_v21 = vld [vmem:[%s6266_s2 + $0x780] ss:$16 sps:$4 sm:$0xff]  }
 0x2cc   : > { %v2035_v23 = vpack.c.bf16 %v1919_v22, %v1916_v20  ;;  %v1921_v24 = vpop.f32.mrb[227].mxu0  ;;  %v4823_v20 = vld [vmem:[%s6266_s2 + $0x784] ss:$16 sps:$4 sm:$0xff]  }
 0x2cd   : > { %v4826_v22 = vld [vmem:[%s6266_s2 + $0x7a4] ss:$16 sps:$4 sm:$0xff]  }
 0x2ce   : > { %2176 = vxpose.xlu0.c.b16.start [1/8] (narrow) %v2035_v23, 16 }
 0x2d0   : > { %v5703_v27 = vpop.trf.xlu0 }
 0x2d1   : > { %v1924_v29 = vpop.f32.mrb[228].mxu0  ;;  %3586 = vmatprep.mubr.bf16.mxu1 %v5703_v27 }
 0x2d2   : > { %v1926_v30 = vpop.f32.mrb[229].mxu0  ;;  %3587 = vmatmul.mubr.bf16.vlgmr.msra.gmra.mrb[0].mxu1 %v5701_v26 }
 0x2d3   : > { %v1927_v31 = vpop.f32.mrb[230].mxu0  ;;  %3596 = vmatpush1.bf16.msra.mxu1 %v4785_v25 }
 0x2d4   : > { %v2036_v33 = vpack.c.bf16 %v1927_v31, %v1924_v29  ;;  %v1929_v36 = vpop.f32.mrb[231].mxu0  ;;  %3597 = vmatprep.subr.bf16.mxu1 %v4790_v28  ;;  %v4824_v28 = vld [vmem:[%s6266_s2 + $0x7a0] ss:$16 sps:$4 sm:$0xff]   ;;  %v4829_v31 = vld [vmem:[%s6266_s2 + $0x7c4] ss:$16 sps:$4 sm:$0xff]  }
 0x2d5   : > { %v4830_v36 = vld [vmem:[%s6266_s2 + $0x7e0] ss:$16 sps:$4 sm:$0xff]  }
 0x2d6   : > { %2177 = vxpose.xlu0.c.b16.cont [2/8] (narrow) %v2036_v33, 16  ;;  %v4832_v33 = vld [vmem:[%s6266_s2 + $0x7e4] ss:$16 sps:$4 sm:$0xff]  }
 0x2d7   : > { %3598 = vmatpush1.bf16.msra.mxu1 %v4788_v32  ;;  %v4827_v32 = vld [vmem:[%s6266_s2 + $0x7c0] ss:$16 sps:$4 sm:$0xff]  }
 0x2d8   : > { %3599 = vmatprep.subr.bf16.mxu1 %v4793_v37  ;;  %v4835_v37 = vld [vmem:[%s6266_s2 + $0xc] ss:$16 sps:$4 sm:$0xff]  }
 0x2d9   : > { %v1932_v40 = vpop.f32.mrb[232].mxu0 }
 0x2da   : > { %v1934_v41 = vpop.f32.mrb[233].mxu0 }
 0x2db   : > { %v1935_v42 = vpop.f32.mrb[234].mxu0  ;;  %3600 = vmatpush1.bf16.msra.mxu1 %v4791_v38  ;;  %v4833_v38 = vld [vmem:[%s6266_s2 + $0x8] ss:$16 sps:$4 sm:$0xff]   ;;  %v4838_v41 = vld [vmem:[%s6266_s2 + $0x2c] ss:$16 sps:$4 sm:$0xff]  }
 0x2dc   : > { %v2037_v44 = vpack.c.bf16 %v1935_v42, %v1932_v40  ;;  %v1937_v45 = vpop.f32.mrb[235].mxu0  ;;  %3601 = vmatprep.subr.bf16.mxu1 %v4796_v39  ;;  %v4836_v42 = vld [vmem:[%s6266_s2 + $0x28] ss:$16 sps:$4 sm:$0xff]  }
 0x2dd   : > { %v4844_v45 = vld [vmem:[%s6266_s2 + $0x6c] ss:$16 sps:$4 sm:$0xff]  }
 0x2de   : > { %2178 = vxpose.xlu0.c.b16.cont [3/8] (narrow) %v2037_v44, 16  ;;  %v4839_v44 = vld [vmem:[%s6266_s2 + $0x48] ss:$16 sps:$4 sm:$0xff]  }
 0x2df   : > { %3602 = vmatpush1.bf16.msra.mxu1 %v4794_v43  ;;  %v4841_v43 = vld [vmem:[%s6266_s2 + $0x4c] ss:$16 sps:$4 sm:$0xff]  }
 0x2e0   : > { %3603 = vmatprep.subr.bf16.mxu1 %v4799_v46  ;;  %v4847_v46 = vld [vmem:[%s6266_s2 + $0x8c] ss:$16 sps:$4 sm:$0xff]  }
 0x2e1   : > { %v1940_v49 = vpop.f32.mrb[236].mxu0 }
 0x2e2   : > { %v1942_v50 = vpop.f32.mrb[237].mxu0 }
 0x2e3   : > { %v1943_v51 = vpop.f32.mrb[238].mxu0  ;;  %3604 = vmatpush1.bf16.msra.mxu1 %v4797_v47  ;;  %v4845_v47 = vld [vmem:[%s6266_s2 + $0x88] ss:$16 sps:$4 sm:$0xff]   ;;  %v4853_v50 = vld [vmem:[%s6266_s2 + $0xcc] ss:$16 sps:$4 sm:$0xff]  }
 0x2e4   : > { %v2038_v53 = vpack.c.bf16 %v1943_v51, %v1940_v49  ;;  %v1945_v54 = vpop.f32.mrb[239].mxu0  ;;  %3605 = vmatprep.subr.bf16.mxu1 %v4802_v48  ;;  %v4850_v48 = vld [vmem:[%s6266_s2 + $0xac] ss:$16 sps:$4 sm:$0xff]   ;;  %v4848_v49 = vld [vmem:[%s6266_s2 + $0xa8] ss:$16 sps:$4 sm:$0xff]  }
 0x2e5   : > { %v4851_v51 = vld [vmem:[%s6266_s2 + $0xc8] ss:$16 sps:$4 sm:$0xff]   ;;  %v4859_v54 = vld [vmem:[%s6266_s2 + $0x10c] ss:$16 sps:$4 sm:$0xff]  }
 0x2e6   : > { %2179 = vxpose.xlu0.c.b16.cont [4/8] (narrow) %v2038_v53, 16  ;;  %v4854_v53 = vld [vmem:[%s6266_s2 + $0xe8] ss:$16 sps:$4 sm:$0xff]  }
 0x2e7   : > { %3606 = vmatpush1.bf16.msra.mxu1 %v4800_v52  ;;  %v4856_v52 = vld [vmem:[%s6266_s2 + $0xec] ss:$16 sps:$4 sm:$0xff]  }
 0x2e8   : > { %3607 = vmatprep.subr.bf16.mxu1 %v4805_v55  ;;  %v4857_v55 = vld [vmem:[%s6266_s2 + $0x108] ss:$16 sps:$4 sm:$0xff]  }
 0x2e9   : > { %v1948_v58 = vpop.f32.mrb[240].mxu0 }
 0x2ea   : > { %v1950_v59 = vpop.f32.mrb[241].mxu0 }
 0x2eb   : > { %v1951_v60 = vpop.f32.mrb[242].mxu0  ;;  %3608 = vmatpush1.bf16.msra.mxu1 %v4803_v56  ;;  %v4862_v56 = vld [vmem:[%s6266_s2 + $0x12c] ss:$16 sps:$4 sm:$0xff]   ;;  %v4863_v59 = vld [vmem:[%s6266_s2 + $0x148] ss:$16 sps:$4 sm:$0xff]  }
 0x2ec   : > { %v2039_v62 = vpack.c.bf16 %v1951_v60, %v1948_v58  ;;  %v1953_v63 = vpop.f32.mrb[243].mxu0  ;;  %3609 = vmatprep.subr.bf16.mxu1 %v4808_v57  ;;  %v4860_v57 = vld [vmem:[%s6266_s2 + $0x128] ss:$16 sps:$4 sm:$0xff]   ;;  %v4865_v58 = vld [vmem:[%s6266_s2 + $0x14c] ss:$16 sps:$4 sm:$0xff]  }
 0x2ed   : > { %v4868_v60 = vld [vmem:[%s6266_s2 + $0x16c] ss:$16 sps:$4 sm:$0xff]   ;;  %v4869_v63 = vld [vmem:[%s6266_s2 + $0x188] ss:$16 sps:$4 sm:$0xff]  }
 0x2ee   : > { %2180 = vxpose.xlu0.c.b16.cont [5/8] (narrow) %v2039_v62, 16  ;;  %v4871_v62 = vld [vmem:[%s6266_s2 + $0x18c] ss:$16 sps:$4 sm:$0xff]  }
 0x2ef   : > { %3610 = vmatpush1.bf16.msra.mxu1 %v4806_v61  ;;  %v4866_v61 = vld [vmem:[%s6266_s2 + $0x168] ss:$16 sps:$4 sm:$0xff]  }
 0x2f0   : > { %3611 = vmatprep.subr.bf16.mxu1 %v4811_v0  ;;  %v4874_v0 = vld [vmem:[%s6266_s2 + $0x1ac] ss:$16 sps:$4 sm:$0xff]  }
 0x2f1   : > { %v1956_v3 = vpop.f32.mrb[244].mxu0 }
 0x2f2   : > { %v1958_v4 = vpop.f32.mrb[245].mxu0 }
 0x2f3   : > { %v1959_v5 = vpop.f32.mrb[246].mxu0  ;;  %3612 = vmatpush1.bf16.msra.mxu1 %v4809_v1  ;;  %v4872_v1 = vld [vmem:[%s6266_s2 + $0x1a8] ss:$16 sps:$4 sm:$0xff]   ;;  %v4880_v4 = vld [vmem:[%s6266_s2 + $0x1ec] ss:$16 sps:$4 sm:$0xff]  }
 0x2f4   : > { %v2040_v7 = vpack.c.bf16 %v1959_v5, %v1956_v3  ;;  %v1961_v8 = vpop.f32.mrb[247].mxu0  ;;  %3613 = vmatprep.subr.bf16.mxu1 %v4814_v2  ;;  %v4877_v2 = vld [vmem:[%s6266_s2 + $0x1cc] ss:$16 sps:$4 sm:$0xff]   ;;  %v4875_v3 = vld [vmem:[%s6266_s2 + $0x1c8] ss:$16 sps:$4 sm:$0xff]  }
 0x2f5   : > { %v4878_v5 = vld [vmem:[%s6266_s2 + $0x1e8] ss:$16 sps:$4 sm:$0xff]   ;;  %v4886_v8 = vld [vmem:[%s6266_s2 + $0x22c] ss:$16 sps:$4 sm:$0xff]  }
 0x2f6   : > { %2181 = vxpose.xlu0.c.b16.cont [6/8] (narrow) %v2040_v7, 16  ;;  %v4881_v7 = vld [vmem:[%s6266_s2 + $0x208] ss:$16 sps:$4 sm:$0xff]  }
 0x2f7   : > { %3614 = vmatpush1.bf16.msra.mxu1 %v4812_v6  ;;  %v4883_v6 = vld [vmem:[%s6266_s2 + $0x20c] ss:$16 sps:$4 sm:$0xff]  }
 0x2f8   : > { %3615 = vmatprep.subr.bf16.mxu1 %v4817_v9  ;;  %v4884_v9 = vld [vmem:[%s6266_s2 + $0x228] ss:$16 sps:$4 sm:$0xff]  }
 0x2f9   : > { %v1964_v12 = vpop.f32.mrb[248].mxu0 }
 0x2fa   : > { %v1966_v14 = vpop.f32.mrb[249].mxu0 }
 0x2fb   : > { %v1967_v15 = vpop.f32.mrb[250].mxu0  ;;  %3616 = vmatpush1.bf16.msra.mxu1 %v4815_v10  ;;  %v4889_v10 = vld [vmem:[%s6266_s2 + $0x24c] ss:$16 sps:$4 sm:$0xff]   ;;  %v4893_v14 = vld [vmem:[%s6266_s2 + $0x288] ss:$16 sps:$4 sm:$0xff]  }
 0x2fc   : > { %v2041_v18 = vpack.c.bf16 %v1967_v15, %v1964_v12  ;;  %v1969_v19 = vpop.f32.mrb[251].mxu0  ;;  %3617 = vmatprep.subr.bf16.mxu1 %v4820_v11  ;;  %v4887_v11 = vld [vmem:[%s6266_s2 + $0x248] ss:$16 sps:$4 sm:$0xff]   ;;  %v4895_v12 = vld [vmem:[%s6266_s2 + $0x28c] ss:$16 sps:$4 sm:$0xff]  }
 0x2fd   : > { %v4898_v15 = vld [vmem:[%s6266_s2 + $0x2ac] ss:$16 sps:$4 sm:$0xff]   ;;  %v4899_v19 = vld [vmem:[%s6266_s2 + $0x2c8] ss:$16 sps:$4 sm:$0xff]  }
 0x2fe   : > { %2182 = vxpose.xlu0.c.b16.cont [7/8] (narrow) %v2041_v18, 16  ;;  %v4901_v18 = vld [vmem:[%s6266_s2 + $0x2cc] ss:$16 sps:$4 sm:$0xff]  }
 0x2ff   : > { %3618 = vmatpush1.bf16.msra.mxu1 %v4818_v17  ;;  %v4896_v17 = vld [vmem:[%s6266_s2 + $0x2a8] ss:$16 sps:$4 sm:$0xff]  }
 0x300   : > { %3619 = vmatprep.subr.bf16.mxu1 %v4823_v20  ;;  %v4904_v20 = vld [vmem:[%s6266_s2 + $0x2ec] ss:$16 sps:$4 sm:$0xff]  }
 0x301   : > { %v1972_v23 = vpop.f32.mrb[252].mxu0 }
 0x302   : > { %v1974_v24 = vpop.f32.mrb[253].mxu0 }
 0x303   : > { %v1975_v25 = vpop.f32.mrb[254].mxu0  ;;  %3620 = vmatpush1.bf16.msra.mxu1 %v4821_v21  ;;  %v4902_v21 = vld [vmem:[%s6266_s2 + $0x2e8] ss:$16 sps:$4 sm:$0xff]   ;;  %v4910_v24 = vld [vmem:[%s6266_s2 + $0x32c] ss:$16 sps:$4 sm:$0xff]  }
 0x304   : > { %v2042_v29 = vpack.c.bf16 %v1975_v25, %v1972_v23  ;;  %v1977_v30 = vpop.f32.mrb[255].mxu0  ;;  %3621 = vmatprep.subr.bf16.mxu1 %v4826_v22  ;;  %v4907_v22 = vld [vmem:[%s6266_s2 + $0x30c] ss:$16 sps:$4 sm:$0xff]   ;;  %v4905_v23 = vld [vmem:[%s6266_s2 + $0x308] ss:$16 sps:$4 sm:$0xff]  }
 0x305   : > { %v4908_v25 = vld [vmem:[%s6266_s2 + $0x328] ss:$16 sps:$4 sm:$0xff]   ;;  %v4916_v30 = vld [vmem:[%s6266_s2 + $0x36c] ss:$16 sps:$4 sm:$0xff]  }
 0x306   : > { %2183 = vxpose.xlu0.c.b16.end [8/8] (narrow) %v2042_v29, 16  ;;  %v4911_v29 = vld [vmem:[%s6266_s2 + $0x348] ss:$16 sps:$4 sm:$0xff]  }
 0x307   : > { %3622 = vmatpush1.bf16.msra.mxu1 %v4824_v28  ;;  %v4913_v28 = vld [vmem:[%s6266_s2 + $0x34c] ss:$16 sps:$4 sm:$0xff]  }
 0x308   : > { %3623 = vmatprep.subr.bf16.mxu1 %v4829_v31  ;;  %v4914_v31 = vld [vmem:[%s6266_s2 + $0x368] ss:$16 sps:$4 sm:$0xff]  }
 0x30b   : > { %3624 = vmatpush1.bf16.msra.mxu1 %v4827_v32  ;;  %v4919_v32 = vld [vmem:[%s6266_s2 + $0x38c] ss:$16 sps:$4 sm:$0xff]  }
 0x30c   : > { %3625 = vmatprep.subr.bf16.mxu1 %v4832_v33  ;;  %v4917_v33 = vld [vmem:[%s6266_s2 + $0x388] ss:$16 sps:$4 sm:$0xff]  }
 0x30f   : > { %3626 = vmatpush1.bf16.msra.mxu1 %v4830_v36  ;;  %v4922_v36 = vld [vmem:[%s6266_s2 + $0x3ac] ss:$16 sps:$4 sm:$0xff]  }
 0x310   : > { %3636 = vmatprep.subr.bf16.mxu1 %v4835_v37  ;;  %v5803_v39 = vpop.trf.xlu1  ;;  %v4920_v37 = vld [vmem:[%s6266_s2 + $0x3a8] ss:$16 sps:$4 sm:$0xff]  }
 0x350   : > { %v5805_v40 = vpop.trf.xlu0 }
 0x351   : > { %3627 = vmatprep.mubr.bf16.mxu1 %v5805_v40 }
 0x352   : > { %3628 = vmatmul.mubr.bf16.vlgmr.msra.gmra.mrb[0].mxu1 %v5803_v39 }
 0x353   : > { %3637 = vmatpush1.bf16.msra.mxu1 %v4833_v38  ;;  %3668 = vmatprep.mubr.bf16.mxu1 %v5480_v13  ;;  %v4842_v13 = vld [vmem:[%s6266_s2 + $0x68] ss:$16 sps:$4 sm:$0xff]   ;;  %v4925_v38 = vld [vmem:[%s6266_s2 + $0x3cc] ss:$16 sps:$4 sm:$0xff]  }
 0x354   : > { %3638 = vmatprep.subr.bf16.mxu1 %v4838_v41  ;;  %v4923_v41 = vld [vmem:[%s6266_s2 + $0x3c8] ss:$16 sps:$4 sm:$0xff]  }
 0x357   : > { %3639 = vmatpush1.bf16.msra.mxu1 %v4836_v42  ;;  %v4928_v42 = vld [vmem:[%s6266_s2 + $0x3ec] ss:$16 sps:$4 sm:$0xff]  }
 0x358   : > { %3640 = vmatprep.subr.bf16.mxu1 %v4841_v43  ;;  %v4926_v43 = vld [vmem:[%s6266_s2 + $0x3e8] ss:$16 sps:$4 sm:$0xff]  }
 0x35b   : > { %3641 = vmatpush1.bf16.msra.mxu1 %v4839_v44  ;;  %v4931_v44 = vld [vmem:[%s6266_s2 + $0x40c] ss:$16 sps:$4 sm:$0xff]  }
 0x35c   : > { %3642 = vmatprep.subr.bf16.mxu1 %v4844_v45  ;;  %v4929_v45 = vld [vmem:[%s6266_s2 + $0x408] ss:$16 sps:$4 sm:$0xff]  }
 0x35f   : > { %3643 = vmatpush1.bf16.msra.mxu1 %v4842_v13  ;;  %v4934_v13 = vld [vmem:[%s6266_s2 + $0x42c] ss:$16 sps:$4 sm:$0xff]  }
 0x360   : > { %3644 = vmatprep.subr.bf16.mxu1 %v4847_v46  ;;  %v4932_v46 = vld [vmem:[%s6266_s2 + $0x428] ss:$16 sps:$4 sm:$0xff]  }
 0x363   : > { %3645 = vmatpush1.bf16.msra.mxu1 %v4845_v47  ;;  %v4937_v47 = vld [vmem:[%s6266_s2 + $0x44c] ss:$16 sps:$4 sm:$0xff]  }
 0x364   : > { %3646 = vmatprep.subr.bf16.mxu1 %v4850_v48  ;;  %v4935_v48 = vld [vmem:[%s6266_s2 + $0x448] ss:$16 sps:$4 sm:$0xff]  }
 0x367   : > { %3647 = vmatpush1.bf16.msra.mxu1 %v4848_v49  ;;  %v4943_v49 = vld [vmem:[%s6266_s2 + $0x48c] ss:$16 sps:$4 sm:$0xff]  }
 0x368   : > { %3648 = vmatprep.subr.bf16.mxu1 %v4853_v50  ;;  %v4941_v50 = vld [vmem:[%s6266_s2 + $0x488] ss:$16 sps:$4 sm:$0xff]  }
 0x36b   : > { %3649 = vmatpush1.bf16.msra.mxu1 %v4851_v51  ;;  %v4946_v51 = vld [vmem:[%s6266_s2 + $0x4ac] ss:$16 sps:$4 sm:$0xff]  }
 0x36c   : > { %3650 = vmatprep.subr.bf16.mxu1 %v4856_v52  ;;  %v4944_v52 = vld [vmem:[%s6266_s2 + $0x4a8] ss:$16 sps:$4 sm:$0xff]  }
 0x36f   : > { %3651 = vmatpush1.bf16.msra.mxu1 %v4854_v53  ;;  %v4949_v53 = vld [vmem:[%s6266_s2 + $0x4cc] ss:$16 sps:$4 sm:$0xff]  }
 0x370   : > { %3652 = vmatprep.subr.bf16.mxu1 %v4859_v54  ;;  %v4947_v54 = vld [vmem:[%s6266_s2 + $0x4c8] ss:$16 sps:$4 sm:$0xff]  }
 0x373   : > { %3653 = vmatpush1.bf16.msra.mxu1 %v4857_v55  ;;  %v4952_v55 = vld [vmem:[%s6266_s2 + $0x4ec] ss:$16 sps:$4 sm:$0xff]  }
 0x374   : > { %3654 = vmatprep.subr.bf16.mxu1 %v4862_v56  ;;  %v4950_v56 = vld [vmem:[%s6266_s2 + $0x4e8] ss:$16 sps:$4 sm:$0xff]  }
 0x377   : > { %3655 = vmatpush1.bf16.msra.mxu1 %v4860_v57  ;;  %v4955_v57 = vld [vmem:[%s6266_s2 + $0x50c] ss:$16 sps:$4 sm:$0xff]  }
 0x378   : > { %3656 = vmatprep.subr.bf16.mxu1 %v4865_v58  ;;  %v4953_v58 = vld [vmem:[%s6266_s2 + $0x508] ss:$16 sps:$4 sm:$0xff]  }
 0x37b   : > { %3657 = vmatpush1.bf16.msra.mxu1 %v4863_v59  ;;  %v4958_v59 = vld [vmem:[%s6266_s2 + $0x52c] ss:$16 sps:$4 sm:$0xff]  }
 0x37c   : > { %3658 = vmatprep.subr.bf16.mxu1 %v4868_v60  ;;  %v4956_v60 = vld [vmem:[%s6266_s2 + $0x528] ss:$16 sps:$4 sm:$0xff]  }
 0x37f   : > { %3659 = vmatpush1.bf16.msra.mxu1 %v4866_v61  ;;  %v4961_v61 = vld [vmem:[%s6266_s2 + $0x54c] ss:$16 sps:$4 sm:$0xff]  }
 0x380   : > { %3660 = vmatprep.subr.bf16.mxu1 %v4871_v62  ;;  %v4959_v62 = vld [vmem:[%s6266_s2 + $0x548] ss:$16 sps:$4 sm:$0xff]  }
 0x383   : > { %3661 = vmatpush1.bf16.msra.mxu1 %v4869_v63  ;;  %v4964_v63 = vld [vmem:[%s6266_s2 + $0x56c] ss:$16 sps:$4 sm:$0xff]  }
 0x384   : > { %3662 = vmatprep.subr.bf16.mxu1 %v4874_v0  ;;  %v4962_v0 = vld [vmem:[%s6266_s2 + $0x568] ss:$16 sps:$4 sm:$0xff]  }
 0x387   : > { %3663 = vmatpush1.bf16.msra.mxu1 %v4872_v1  ;;  %v4967_v1 = vld [vmem:[%s6266_s2 + $0x58c] ss:$16 sps:$4 sm:$0xff]  }
 0x388   : > { %3664 = vmatprep.subr.bf16.mxu1 %v4877_v2  ;;  %v4965_v2 = vld [vmem:[%s6266_s2 + $0x588] ss:$16 sps:$4 sm:$0xff]  }
 0x38b   : > { %3665 = vmatpush1.bf16.msra.mxu1 %v4875_v3  ;;  %v4970_v3 = vld [vmem:[%s6266_s2 + $0x5ac] ss:$16 sps:$4 sm:$0xff]  }
 0x38c   : > { %3666 = vmatprep.subr.bf16.mxu1 %v4880_v4  ;;  %v4968_v4 = vld [vmem:[%s6266_s2 + $0x5a8] ss:$16 sps:$4 sm:$0xff]  }
 0x38f   : > { %3667 = vmatpush1.bf16.msra.mxu1 %v4878_v5  ;;  %v4973_v5 = vld [vmem:[%s6266_s2 + $0x5cc] ss:$16 sps:$4 sm:$0xff]  }
 0x390   : > { %3677 = vmatprep.subr.bf16.mxu1 %v4883_v6  ;;  %v4971_v6 = vld [vmem:[%s6266_s2 + $0x5c8] ss:$16 sps:$4 sm:$0xff]  }
 0x392   : > { %3669 = vmatmul.mubr.bf16.vlgmr.msra.gmra.mrb[4].mxu1 %v5489_v16  ;;  %v4892_v16 = vld [vmem:[%s6266_s2 + $0x26c] ss:$16 sps:$4 sm:$0xff]  }
 0x393   : > { %3678 = vmatpush1.bf16.msra.mxu1 %v4881_v7  ;;  %3709 = vmatprep.mubr.bf16.mxu1 %v5601_v35  ;;  %v4890_v35 = vld [vmem:[%s6266_s2 + $0x268] ss:$16 sps:$4 sm:$0xff]   ;;  %v4976_v7 = vld [vmem:[%s6266_s2 + $0x5ec] ss:$16 sps:$4 sm:$0xff]  }
 0x394   : > { %3679 = vmatprep.subr.bf16.mxu1 %v4886_v8  ;;  %v4974_v8 = vld [vmem:[%s6266_s2 + $0x5e8] ss:$16 sps:$4 sm:$0xff]  }
 0x397   : > { %3680 = vmatpush1.bf16.msra.mxu1 %v4884_v9  ;;  %v4979_v9 = vld [vmem:[%s6266_s2 + $0x60c] ss:$16 sps:$4 sm:$0xff]  }
 0x398   : > { %3681 = vmatprep.subr.bf16.mxu1 %v4889_v10  ;;  %v4977_v10 = vld [vmem:[%s6266_s2 + $0x608] ss:$16 sps:$4 sm:$0xff]  }
 0x39b   : > { %3682 = vmatpush1.bf16.msra.mxu1 %v4887_v11  ;;  %v4982_v11 = vld [vmem:[%s6266_s2 + $0x62c] ss:$16 sps:$4 sm:$0xff]  }
 0x39c   : > { %3683 = vmatprep.subr.bf16.mxu1 %v4892_v16  ;;  %v4980_v16 = vld [vmem:[%s6266_s2 + $0x628] ss:$16 sps:$4 sm:$0xff]  }
 0x39f   : > { %3684 = vmatpush1.bf16.msra.mxu1 %v4890_v35  ;;  %v4985_v35 = vld [vmem:[%s6266_s2 + $0x64c] ss:$16 sps:$4 sm:$0xff]  }
 0x3a0   : > { %3685 = vmatprep.subr.bf16.mxu1 %v4895_v12  ;;  %v2044_v12 = vlaneseq }
 0x3a3   : > { %3686 = vmatpush1.bf16.msra.mxu1 %v4893_v14  ;;  %v4983_v14 = vld [vmem:[%s6266_s2 + $0x648] ss:$16 sps:$4 sm:$0xff]  }
 0x3a4   : > { %3687 = vmatprep.subr.bf16.mxu1 %v4898_v15  ;;  %v4986_v15 = vld [vmem:[%s6266_s2 + $0x668] ss:$16 sps:$4 sm:$0xff]  }
 0x3a7   : > { %3688 = vmatpush1.bf16.msra.mxu1 %v4896_v17  ;;  %v4991_v17 = vld [vmem:[%s6266_s2 + $0x68c] ss:$16 sps:$4 sm:$0xff]  }
 0x3a8   : > { %3689 = vmatprep.subr.bf16.mxu1 %v4901_v18 }
 0x3ab   : > { %3690 = vmatpush1.bf16.msra.mxu1 %v4899_v19  ;;  %v4989_v19 = vld [vmem:[%s6266_s2 + $0x688] ss:$16 sps:$4 sm:$0xff]  }
 0x3ac   : > { %3691 = vmatprep.subr.bf16.mxu1 %v4904_v20  ;;  %v6134_v20 = vld [vmem:[%s6267_s3] sm:$0xf] }
 0x3af   : > { %3692 = vmatpush1.bf16.msra.mxu1 %v4902_v21 }
 0x3b0   : > { %3693 = vmatprep.subr.bf16.mxu1 %v4907_v22  ;;  %v4994_v22 = vld [vmem:[%s6266_s2 + $0x6ac] ss:$16 sps:$4 sm:$0xff]  }
 0x3b3   : > { %3694 = vmatpush1.bf16.msra.mxu1 %v4905_v23 }
 0x3b4   : > { %3695 = vmatprep.subr.bf16.mxu1 %v4910_v24  ;;  %v4992_v24 = vld [vmem:[%s6266_s2 + $0x6a8] ss:$16 sps:$4 sm:$0xff]  }
 0x3b7   : > { %3696 = vmatpush1.bf16.msra.mxu1 %v4908_v25 }
 0x3b8   : > { %3697 = vmatprep.subr.bf16.mxu1 %v4913_v28  ;;  %v4997_v28 = vld [vmem:[%s6266_s2 + $0x6cc] ss:$16 sps:$4 sm:$0xff]  }
 0x3bb   : > { %3698 = vmatpush1.bf16.msra.mxu1 %v4911_v29 }
 0x3bc   : > { %3699 = vmatprep.subr.bf16.mxu1 %v4916_v30 }
 0x3bf   : > { %3700 = vmatpush1.bf16.msra.mxu1 %v4914_v31 }
 0x3c0   : > { %3701 = vmatprep.subr.bf16.mxu1 %v4919_v32 }
 0x3c3   : > { %3702 = vmatpush1.bf16.msra.mxu1 %v4917_v33 }
 0x3c4   : > { %3703 = vmatprep.subr.bf16.mxu1 %v4922_v36  ;;  %v4995_v36 = vld [vmem:[%s6266_s2 + $0x6c8] ss:$16 sps:$4 sm:$0xff]  }
 0x3c7   : > { %3704 = vmatpush1.bf16.msra.mxu1 %v4920_v37 }
 0x3c8   : > { %3705 = vmatprep.subr.bf16.mxu1 %v4925_v38  ;;  %v5000_v38 = vld [vmem:[%s6266_s2 + $0x6ec] ss:$16 sps:$4 sm:$0xff]  }
 0x3cb   : > { %3706 = vmatpush1.bf16.msra.mxu1 %v4923_v41 }
 0x3cc   : > { %3707 = vmatprep.subr.bf16.mxu1 %v4928_v42  ;;  %v4998_v42 = vld [vmem:[%s6266_s2 + $0x6e8] ss:$16 sps:$4 sm:$0xff]  }
 0x3cf   : > { %3708 = vmatpush1.bf16.msra.mxu1 %v4926_v43  ;;  %v5003_v43 = vld [vmem:[%s6266_s2 + $0x70c] ss:$16 sps:$4 sm:$0xff]  }
 0x3d0   : > { %3718 = vmatprep.subr.bf16.mxu1 %v4931_v44  ;;  %v5001_v44 = vld [vmem:[%s6266_s2 + $0x708] ss:$16 sps:$4 sm:$0xff]  }
 0x3d2   : > { %3710 = vmatmul.mubr.bf16.vlgmr.msra.gmra.mrb[4].mxu1 %v5599_v34  ;;  %v4940_v34 = vld [vmem:[%s6266_s2 + $0x46c] ss:$16 sps:$4 sm:$0xff]  }
 0x3d3   : > { %3719 = vmatpush1.bf16.msra.mxu1 %v4929_v45  ;;  %3750 = vmatprep.mubr.bf16.mxu1 %v5703_v27  ;;  %v4938_v27 = vld [vmem:[%s6266_s2 + $0x468] ss:$16 sps:$4 sm:$0xff]   ;;  %v5006_v45 = vld [vmem:[%s6266_s2 + $0x72c] ss:$16 sps:$4 sm:$0xff]  }
 0x3d4   : > { %3720 = vmatprep.subr.bf16.mxu1 %v4934_v13  ;;  %v5004_v13 = vld [vmem:[%s6266_s2 + $0x728] ss:$16 sps:$4 sm:$0xff]  }
 0x3d7   : > { %3721 = vmatpush1.bf16.msra.mxu1 %v4932_v46  ;;  %v5009_v46 = vld [vmem:[%s6266_s2 + $0x74c] ss:$16 sps:$4 sm:$0xff]  }
 0x3d8   : > { %3722 = vmatprep.subr.bf16.mxu1 %v4937_v47  ;;  %v5007_v47 = vld [vmem:[%s6266_s2 + $0x748] ss:$16 sps:$4 sm:$0xff]  }
 0x3db   : > { %3723 = vmatpush1.bf16.msra.mxu1 %v4935_v48  ;;  %v5012_v48 = vld [vmem:[%s6266_s2 + $0x76c] ss:$16 sps:$4 sm:$0xff]  }
 0x3dc   : > { %3724 = vmatprep.subr.bf16.mxu1 %v4940_v34  ;;  %v5010_v34 = vld [vmem:[%s6266_s2 + $0x768] ss:$16 sps:$4 sm:$0xff]  }
 0x3df   : > { %3725 = vmatpush1.bf16.msra.mxu1 %v4938_v27  ;;  %v5015_v27 = vld [vmem:[%s6266_s2 + $0x78c] ss:$16 sps:$4 sm:$0xff]  }
 0x3e0   : > { %3726 = vmatprep.subr.bf16.mxu1 %v4943_v49  ;;  %v5013_v49 = vld [vmem:[%s6266_s2 + $0x788] ss:$16 sps:$4 sm:$0xff]  }
 0x3e3   : > { %3727 = vmatpush1.bf16.msra.mxu1 %v4941_v50  ;;  %v5018_v50 = vld [vmem:[%s6266_s2 + $0x7ac] ss:$16 sps:$4 sm:$0xff]  }
 0x3e4   : > { %3728 = vmatprep.subr.bf16.mxu1 %v4946_v51  ;;  %v5016_v51 = vld [vmem:[%s6266_s2 + $0x7a8] ss:$16 sps:$4 sm:$0xff]  }
 0x3e7   : > { %3729 = vmatpush1.bf16.msra.mxu1 %v4944_v52  ;;  %v5021_v52 = vld [vmem:[%s6266_s2 + $0x7cc] ss:$16 sps:$4 sm:$0xff]  }
 0x3e8   : > { %3730 = vmatprep.subr.bf16.mxu1 %v4949_v53  ;;  %v5019_v53 = vld [vmem:[%s6266_s2 + $0x7c8] ss:$16 sps:$4 sm:$0xff]  }
 0x3eb   : > { %3731 = vmatpush1.bf16.msra.mxu1 %v4947_v54  ;;  %v5024_v54 = vld [vmem:[%s6266_s2 + $0x7ec] ss:$16 sps:$4 sm:$0xff]  }
 0x3ec   : > { %3732 = vmatprep.subr.bf16.mxu1 %v4952_v55  ;;  %v5022_v55 = vld [vmem:[%s6266_s2 + $0x7e8] ss:$16 sps:$4 sm:$0xff]  }
 0x3ef   : > { %3733 = vmatpush1.bf16.msra.mxu1 %v4950_v56 }
 0x3f0   : > { %3734 = vmatprep.subr.bf16.mxu1 %v4955_v57  ;;  %v5091_v57 = vmov 1983009808  }
 0x3f3   : > { %3735 = vmatpush1.bf16.msra.mxu1 %v4953_v58  ;;  %v3807_v58 = vunpack.c.l.s4 %v5091_v57 }
 0x3f4   : > { %3736 = vmatprep.subr.bf16.mxu1 %v4958_v59 }
 0x3f7   : > { %3737 = vmatpush1.bf16.msra.mxu1 %v4956_v60 }
 0x3f8   : > { %3738 = vmatprep.subr.bf16.mxu1 %v4961_v61  ;;  %v3808_v61 = vunpack.c.0.s8 %v3807_v58 }
 0x3fb   : > { %3739 = vmatpush1.bf16.msra.mxu1 %v4959_v62 }
 0x3fc   : > { %3740 = vmatprep.subr.bf16.mxu1 %v4964_v63 }
 0x3ff   : > { %3741 = vmatpush1.bf16.msra.mxu1 %v4962_v0 }
 0x400   : > { %3742 = vmatprep.subr.bf16.mxu1 %v4967_v1 }
 0x403   : > { %3743 = vmatpush1.bf16.msra.mxu1 %v4965_v2 }
 0x404   : > { %3744 = vmatprep.subr.bf16.mxu1 %v4970_v3 }
 0x407   : > { %3745 = vmatpush1.bf16.msra.mxu1 %v4968_v4 }
 0x408   : > { %3746 = vmatprep.subr.bf16.mxu1 %v4973_v5 }
 0x40b   : > { %3747 = vmatpush1.bf16.msra.mxu1 %v4971_v6 }
 0x40c   : > { %3748 = vmatprep.subr.bf16.mxu1 %v4976_v7 }
 0x40f   : > { %3749 = vmatpush1.bf16.msra.mxu1 %v4974_v8 }
 0x410   : > { %3759 = vmatprep.subr.bf16.mxu1 %v4979_v9 }
 0x412   : > { %3751 = vmatmul.mubr.bf16.vlgmr.msra.gmra.mrb[4].mxu1 %v5701_v26  ;;  %v4988_v26 = vld [vmem:[%s6266_s2 + $0x66c] ss:$16 sps:$4 sm:$0xff]  }
 0x413   : > { %3760 = vmatpush1.bf16.msra.mxu1 %v4977_v10  ;;  %3791 = vmatprep.mubr.bf16.mxu1 %v5805_v40  ;;  %v6119_v40 = vshrl.u32 %v2044_v12, 7 }
 0x414   : > { %3761 = vmatprep.subr.bf16.mxu1 %v4982_v11 }
 0x415   : > { %v2046_v18 = vsub.s32 0, %v6119_v40  ;;  %v2050_v21 = vsub.s32 1, %v6119_v40  ;;  %v2054_v56 = vsub.s32 2, %v6119_v40  ;;  %v2058_v59 = vsub.s32 3, %v6119_v40 }
 0x416   : > { %v3811_v2 = vsub.s32 %v3808_v61, %v6119_v40 }
 0x417   : > { %3762 = vmatpush1.bf16.msra.mxu1 %v4980_v16  ;;  %v2047_v23 = vrot.slane %v6134_v20, %v2046_v18  ;;  %v2051_v25 = vrot.slane %v6134_v20, %v2050_v21  ;;  %v2055_v60 = vrot.slane %v6134_v20, %v2054_v56  ;;  %v2059_v62 = vrot.slane %v6134_v20, %v2058_v59 }
 0x418   : > { %3763 = vmatprep.subr.bf16.mxu1 %v4985_v35 }
 0x41b   : > { %3764 = vmatpush1.bf16.msra.mxu1 %v4983_v14 }
 0x41c   : > { %3765 = vmatprep.subr.bf16.mxu1 %v4988_v26 }
 0x41f   : > { %3766 = vmatpush1.bf16.msra.mxu1 %v4986_v15 }
 0x420   : > { %3767 = vmatprep.subr.bf16.mxu1 %v4991_v17 }
 0x423   : > { %3768 = vmatpush1.bf16.msra.mxu1 %v4989_v19 }
 0x424   : > { %3769 = vmatprep.subr.bf16.mxu1 %v4994_v22 }
 0x425   : > { %v3629_v29 = vpop.f32.mrb[0].mxu1 }
 0x426   : > { %v6148_v30 = vadd.f32 %v3629_v29, %v2047_v23  ;;  %v3631_v31 = vpop.f32.mrb[1].mxu1 }
 0x427   : > { %v6150_v32 = vadd.f32 %v3631_v31, %v2051_v25  ;;  %3770 = vmatpush1.bf16.msra.mxu1 %v4992_v24  ;;  %v3633_v33 = vpop.f32.mrb[2].mxu1 }
 0x428   : > { %v3634_v37 = vpop.f32.mrb[3].mxu1  ;;  %3771 = vmatprep.subr.bf16.mxu1 %v4997_v28 }
 0x429   : > { %v3804_v41 = vcombine.low %v6148_v30, %v6150_v32 }
 0x42b   : > { %3772 = vmatpush1.bf16.msra.mxu1 %v4995_v36  ;;  %v3812_v6 = vrot.slane %v3804_v41, %v3811_v2 }
 0x42c   : > { %3773 = vmatprep.subr.bf16.mxu1 %v5000_v38 }
 0x42f   : > { %3774 = vmatpush1.bf16.msra.mxu1 %v4998_v42 }
 0x430   : > { %3775 = vmatprep.subr.bf16.mxu1 %v5003_v43 }
 0x433   : > { %3776 = vmatpush1.bf16.msra.mxu1 %v5001_v44 }
 0x434   : > { %3777 = vmatprep.subr.bf16.mxu1 %v5006_v45 }
 0x437   : > { %3778 = vmatpush1.bf16.msra.mxu1 %v5004_v13 }
 0x438   : > { %3779 = vmatprep.subr.bf16.mxu1 %v5009_v46 }
 0x43b   : > { %3780 = vmatpush1.bf16.msra.mxu1 %v5007_v47 }
 0x43c   : > { %3781 = vmatprep.subr.bf16.mxu1 %v5012_v48 }
 0x43f   : > { %3782 = vmatpush1.bf16.msra.mxu1 %v5010_v34 }
 0x440   : > { %3783 = vmatprep.subr.bf16.mxu1 %v5015_v27 }
 0x443   : > { %3784 = vmatpush1.bf16.msra.mxu1 %v5013_v49 }
 0x444   : > { %3785 = vmatprep.subr.bf16.mxu1 %v5018_v50 }
 0x447   : > { %3786 = vmatpush1.bf16.msra.mxu1 %v5016_v51 }
 0x448   : > { %3787 = vmatprep.subr.bf16.mxu1 %v5021_v52 }
 0x44b   : > { %3788 = vmatpush1.bf16.msra.mxu1 %v5019_v53 }
 0x44c   : > { %3789 = vmatprep.subr.bf16.mxu1 %v5024_v54 }
 0x44f   : > { %3790 = vmatpush1.bf16.msra.mxu1 %v5022_v55 }
 0x452   : > { %3792 = vmatmul.mubr.bf16.vlgmr.msra.gmra.mrb[4].mxu1 %v5803_v39 }
 0x525   : > { %v3793_v63 = vpop.f32.mrb[4].mxu1 }
 0x526   : > { %v4371_v0 = vadd.f32 %v3793_v63, %v2055_v60  ;;  %v3795_v1 = vpop.f32.mrb[5].mxu1 }
 0x527   : > { %v4372_v39 = vadd.f32 %v3795_v1, %v2059_v62  ;;  %v3797_v3 = vpop.f32.mrb[6].mxu1 }
 0x528   : > { %v3798_v4 = vpop.f32.mrb[7].mxu1 }
 0x529   : > { %v3805_v5 = vcombine.low %v4371_v0, %v4372_v39 }
 0x52b   : > { %v3819_v7 = vrot.slane %v3805_v5, %v3811_v2 }
 0x52d   : > { %v3820_v8 = vcombine.low %v3812_v6, %v3819_v7 }
 0x52f   : > { %3822 = vst [vmem:[%s190_s5] sm:$0xff] %v3820_v8 }
 0x530   : > { %5038 = shalt.err (!%p5035_p3)
}
 0x531   : > { %s5039_s14 = scalar_lea.hbm %s6222_s9, 128  ;;  %s5043_s23 = scalar_lea.hbm %s6268_s4, 256 }
 0x532   : > { %p5040_p4 = scmp.ne.s32.totalorder %s6222_s9, %s5039_s14  ;;  %p5044_p9 = scmp.lt.u32.totalorder %s6222_s9, %s6268_s4 }
 0x533   : > { %p5045_p10 = scmp.lt.u32.totalorder %s5043_s23, %s5039_s14  ;;  %p5047_p12 = scmp.lt.u32.totalorder %s5039_s14, %s6222_s9 }
 0x534   : > { %p5041_p7 = pnand %p5040_p4, %p5156_p5 }
 0x535   : > { %p5046_p11 = por %p5045_p10, %p5044_p9 }
 0x536   : > { %p5042_p8 = pneg %p5041_p7 }
 0x537   : > { %p5048_p13 = por %p5047_p12, %p5046_p11 }
 0x539   : > { %p5049_p0 = pnand %p5048_p13, %p5042_p8 }
 0x53b   : > { %5052 = shalt.err (!%p5049_p0)
}
 0x53c   : > { %4397 = dma.vmem_to_hbm [thread:$0]  (%p5156_p5), %s6224_s6, 128, %s6222_s9, %s3824_s10  }
 0x53d PF: > { %p4403_p1 = scmp.ge.s32.totalorder %s5087_s18, 2  ;;  %s3850_s29 = sand.u32 1, %s5075_s15  }
 0x53e   : > { %s3851_s30 = scalar_lea.sflag [#allocation3], %s3850_s29 }
 0x53f   : > { %p4400_p2 = pnand %p4403_p1, %p5160_p6 }
 0x541   : > { %5070 = dma.done.wait (!%p4400_p2), %s3851_s30, 128  }
 0x542   : > { %5072 = vsyncadd (!%p4400_p2), %s3851_s30, 4294967168  ;;  %p14_p3 = scmp.ge.s32.totalorder %s5143_s21, 4   ;;  %s6271_s15 = smov %s5079_s16 }
 0x543   : > { %s6272_s16 = smov %s5083_s17  ;;  %s6273_s17 = smov %s5154_s24 }
 0x544   : > { %s6274_s18 = smov %s5143_s21  ;;  %16 = sbr.rel (!%p14_p3) target bundleno = 3 (0x3), region = 71 }
 0x54b   :  { %3856 = vsyncpa [#allocation3], 1 }
 0x54c   :  { %3858 = vsyncpa [#allocation3 + $0x1], 1 }

</bundles_post_ra>
